<compile_context>
chip_gen: v7x
topology: tpu7x:2x2x1
jax: 0.10.0
libtpu: 0.0.40
codegen_flags: <defaults>
</compile_context>

<pallas_src>
import functools

import jax
import jax.numpy as jnp
from jax import lax
from jax.experimental import pallas as pl
from jax.experimental.pallas import tpu as pltpu

EPS = 1e-5  # torch.nn.LayerNorm default eps


def _spec(shape):
    # whole-array block (block_shape == array shape satisfies the (8,128) rule)
    return pl.BlockSpec(shape, lambda i: (0,) * len(shape))


# ------------------------------------------------------------ fused kernel ---

def _fused_kernel(src_col_ref, dst_col_ref, dst_row_ref,
                  xr_ref, gr_ref,
                  wn_ref, bn_ref, we_ref, be_ref,
                  l0wx_ref, l0bx_ref, l0we_ref, l0be_ref,
                  lng_ref, lnb_ref, wmsg_ref, wedg_ref, bmsg_ref,
                  wout_ref, bout_ref,
                  dw1_ref, dw2_ref, dw3_ref, db_ref, scale_ref,
                  z_ref, *, num_layers, num_nodes, hidden, out_dim):
    f32 = jnp.float32
    bf16 = jnp.bfloat16
    E = src_col_ref.shape[0]
    N = num_nodes
    H = hidden

    def mm(a, b):
        # weight matmuls: bf16 operands on the MXU, f32 accumulation
        return jnp.dot(a.astype(bf16), b.astype(bf16),
                       preferred_element_type=f32)

    # ---- incidence matrices built in-kernel from edge indices ----------------
    iota_en = lax.broadcasted_iota(jnp.int32, (E, N), 1)
    ssrc = (src_col_ref[...] == iota_en).astype(f32)        # (E, N) gather @ src
    sdst = (dst_col_ref[...] == iota_en).astype(f32)        # (E, N) gather @ dst
    iota_ne = lax.broadcasted_iota(jnp.int32, (N, E), 0)
    sdst_t = (dst_row_ref[...] == iota_ne).astype(f32)      # (N, E) scatter-add
    deg = jnp.sum(sdst_t, axis=-1, keepdims=True)           # (N, 1)
    # fold mean aggregation (1/deg) into the scatter matrix once
    sdst_mean = sdst_t * (1.0 / jnp.maximum(deg, 1.0))

    inv_h = 1.0 / float(H)

    def ln_relu(v, gamma, beta):
        mu = jnp.sum(v, axis=-1, keepdims=True) * inv_h
        d = v - mu
        var = jnp.sum(d * d, axis=-1, keepdims=True) * inv_h
        return jnp.maximum(d * lax.rsqrt(var + EPS) * gamma + beta, 0.0)

    # ---- encoders -------------------------------------------------------------
    x = mm(xr_ref[...], wn_ref[...]) + bn_ref[...]           # (N, H)
    g = mm(gr_ref[...], we_ref[...]) + be_ref[...]           # (E, H)

    # ---- layers[0]: IntraNodeAggConv(internode_message=False) ----------------
    # TODO(synk): IntraNodeAggConv source unavailable; stand-in = per-row Linear+ReLU.
    x = jnp.maximum(mm(x, l0wx_ref[...]) + l0bx_ref[...], 0.0)
    g = jnp.maximum(mm(g, l0we_ref[...]) + l0be_ref[...], 0.0)

    # ---- layers[1:]: ModDeepGCNLayer(block='res+') ----------------------------
    def layer_body(l, carry):
        x, g = carry
        gamma = lng_ref[l]                                   # (1, H)
        beta = lnb_ref[l]
        h = ln_relu(x, gamma, beta)                          # norm -> act (shared
        ge = ln_relu(g, gamma, beta)                         # norm, as in res+)
        # TODO(synk): conv stand-in (message MLP over (h[src], edge_attr) + mean
        # scatter to dst); IntraNodeAggConv source not provided.
        # Weight matmul in node space first, then exact one-hot gather to edges
        # (row selection commutes with the right-multiplication => same values,
        # fewer MACs whenever E > N).
        hm = mm(h, wmsg_ref[l])                              # (N, H)
        msg = (jnp.dot(ssrc, hm, preferred_element_type=f32)
               + mm(ge, wedg_ref[l]) + bmsg_ref[l])
        msg = jnp.maximum(msg, 0.0)                          # (E, H)
        agg = jnp.dot(sdst_mean, msg, preferred_element_type=f32)   # (N, H) mean
        h_out = mm(agg, wout_ref[l]) + bout_ref[l]
        return (x + h_out, g + msg)                          # res+ skip

    x, g = lax.fori_loop(0, num_layers, layer_body, (x, g), unroll=True)

    # ---- x = layers[1].act(layers[1].norm(x)); same for edge_attr -------------
    gamma0 = lng_ref[0]
    beta0 = lnb_ref[0]
    x = ln_relu(x, gamma0, beta0)
    g = ln_relu(g, gamma0, beta0)

    # ---- EdgeDecoder: cat([X[src], X[dst], edge_attr]) -> Linear -> ReLU -------
    # Split matmul (W = [W1; W2; W3]) with the node-side pieces re-associated to
    # node space before the exact one-hot gather (out_dim << H => fewer MACs).
    xw1 = mm(x, dw1_ref[...])                                # (N, out)
    xw2 = mm(x, dw2_ref[...])                                # (N, out)
    z = (jnp.dot(ssrc, xw1, preferred_element_type=f32)
         + jnp.dot(sdst, xw2, preferred_element_type=f32)
         + mm(g, dw3_ref[...]) + db_ref[...])
    z = jnp.maximum(z, 0.0)                                  # (E, out_dim)

    # ---- fold scale_param concat into the kernel output ------------------------
    # scale_param only exists when output_channels == 1, so out_dim == 1 and the
    # (E, 1) z broadcasts cleanly against the (E, 2*out_dim) column mask.
    s = scale_ref[...]                                       # (1, 1)
    col = lax.broadcasted_iota(jnp.int32, (E, 2 * out_dim), 1)
    z_ref[...] = jnp.where(col < out_dim, z, s)


# -------------------------------------------------------- parameter setup ----

def _uniform(key, shape, fan_in):
    lim = 1.0 / jnp.sqrt(float(fan_in))
    return jax.random.uniform(key, shape, jnp.float32, -lim, lim)


def init_params(key, node_ch, edge_ch, hidden, num_layers, out_ch):
    keys = list(jax.random.split(key, 10 + 5 * num_layers))
    ki = iter(keys)
    p = {}
    # encoders
    p["w_node"] = _uniform(next(ki), (node_ch, hidden), node_ch)
    p["b_node"] = _uniform(next(ki), (1, hidden), node_ch)
    p["w_edge"] = _uniform(next(ki), (edge_ch, hidden), edge_ch)
    p["b_edge"] = _uniform(next(ki), (1, hidden), edge_ch)
    # layers[0] (IntraNodeAggConv, internode_message=False) stand-in
    p["l0_wx"] = _uniform(next(ki), (hidden, hidden), hidden)
    p["l0_bx"] = _uniform(next(ki), (1, hidden), hidden)
    p["l0_we"] = _uniform(next(ki), (hidden, hidden), hidden)
    p["l0_be"] = _uniform(next(ki), (1, hidden), hidden)
    # deep res+ layers: weights stacked along a leading layer axis
    p["ln_g"] = jnp.ones((num_layers, 1, hidden), jnp.float32)
    p["ln_b"] = jnp.zeros((num_layers, 1, hidden), jnp.float32)
    p["w_msg"] = jnp.stack(
        [_uniform(next(ki), (hidden, hidden), hidden) for _ in range(num_layers)])
    p["w_edge_l"] = jnp.stack(
        [_uniform(next(ki), (hidden, hidden), hidden) for _ in range(num_layers)])
    p["b_msg"] = jnp.stack(
        [_uniform(next(ki), (1, hidden), hidden) for _ in range(num_layers)])
    p["w_out"] = jnp.stack(
        [_uniform(next(ki), (hidden, hidden), hidden) for _ in range(num_layers)])
    p["b_out"] = jnp.stack(
        [_uniform(next(ki), (1, hidden), hidden) for _ in range(num_layers)])
    # edge decoder: Linear(3*hidden, out_ch) split into three (hidden, out_ch) chunks
    wdec = _uniform(next(ki), (3 * hidden, out_ch), 3 * hidden)
    p["dec_w1"] = wdec[:hidden]
    p["dec_w2"] = wdec[hidden:2 * hidden]
    p["dec_w3"] = wdec[2 * hidden:]
    p["dec_b"] = _uniform(next(ki), (1, out_ch), 3 * hidden)
    # scale_param (output_channels == 1)
    p["scale"] = jnp.ones((1, 1), jnp.float32)
    return p


# ----------------------------------------------------------------- forward ---

def deeper_intranode_agg_gnn(params, x_raw, edge_index, edge_attr_raw, num_nodes):
    n, _ = x_raw.shape
    e, _ = edge_attr_raw.shape
    hidden = params["w_node"].shape[1]
    out_dim = params["dec_w1"].shape[1]
    num_layers = params["ln_g"].shape[0]
    bf16 = jnp.bfloat16

    src_col = edge_index[0].astype(jnp.int32).reshape(e, 1)
    dst_col = edge_index[1].astype(jnp.int32).reshape(e, 1)
    dst_row = edge_index[1].astype(jnp.int32).reshape(1, e)

    ins = [
        src_col, dst_col, dst_row,
        x_raw, edge_attr_raw,
        params["w_node"].astype(bf16), params["b_node"],
        params["w_edge"].astype(bf16), params["b_edge"],
        params["l0_wx"].astype(bf16), params["l0_bx"],
        params["l0_we"].astype(bf16), params["l0_be"],
        params["ln_g"], params["ln_b"],
        params["w_msg"].astype(bf16), params["w_edge_l"].astype(bf16), params["b_msg"],
        params["w_out"].astype(bf16), params["b_out"],
        params["dec_w1"].astype(bf16), params["dec_w2"].astype(bf16),
        params["dec_w3"].astype(bf16), params["dec_b"],
        params["scale"],
    ]

    kernel = functools.partial(
        _fused_kernel, num_layers=num_layers, num_nodes=num_nodes,
        hidden=hidden, out_dim=out_dim)

    return pl.pallas_call(
        kernel,
        grid=(1,),
        in_specs=[_spec(a.shape) for a in ins],
        out_specs=_spec((e, 2 * out_dim)),
        out_shape=jax.ShapeDtypeStruct((e, 2 * out_dim), jnp.float32),
        compiler_params=pltpu.CompilerParams(
            dimension_semantics=("arbitrary",)),
    )(*ins)


# -------------------------------------------------------------------- main ---

if __name__ == "__main__":
    NODE_CH, EDGE_CH, HIDDEN = 4, 6, 32
    NUM_LAYERS, OUT_CH = 2, 1
    N_NODES, N_EDGES = 16, 32

    key = jax.random.PRNGKey(0)
    k_par, k_x, k_e, k_src, k_dst = jax.random.split(key, 5)

    params = init_params(k_par, NODE_CH, EDGE_CH, HIDDEN, NUM_LAYERS, OUT_CH)

    x_raw = jax.random.normal(k_x, (N_NODES, NODE_CH), jnp.float32)
    edge_attr_raw = jax.random.normal(k_e, (N_EDGES, EDGE_CH), jnp.float32)
    edge_index = jnp.stack([
        jax.random.randint(k_src, (N_EDGES,), 0, N_NODES),
        jax.random.randint(k_dst, (N_EDGES,), 0, N_NODES),
    ], axis=0)

    fwd = jax.jit(functools.partial(deeper_intranode_agg_gnn, num_nodes=N_NODES))
    z = fwd(params, x_raw, edge_index, edge_attr_raw)
    z = jax.block_until_ready(z)
    assert z.shape == (N_EDGES, 2 * OUT_CH)
    assert bool(jnp.all(jnp.isfinite(z)))
    print("KERNEL_OK")
</pallas_src>

<mosaic_0001>
module attributes {stable_mosaic.version = 11 : i64} {
  func.func @_fused_kernel(%arg0: i32, %arg1: memref<32x1xi32, #tpu.memory_space<vmem>>, %arg2: memref<32x1xi32, #tpu.memory_space<vmem>>, %arg3: memref<1x32xi32, #tpu.memory_space<vmem>>, %arg4: memref<16x4xf32, #tpu.memory_space<vmem>>, %arg5: memref<32x6xf32, #tpu.memory_space<vmem>>, %arg6: memref<4x32xbf16, #tpu.memory_space<vmem>>, %arg7: memref<1x32xf32, #tpu.memory_space<vmem>>, %arg8: memref<6x32xbf16, #tpu.memory_space<vmem>>, %arg9: memref<1x32xf32, #tpu.memory_space<vmem>>, %arg10: memref<32x32xbf16, #tpu.memory_space<vmem>>, %arg11: memref<1x32xf32, #tpu.memory_space<vmem>>, %arg12: memref<32x32xbf16, #tpu.memory_space<vmem>>, %arg13: memref<1x32xf32, #tpu.memory_space<vmem>>, %arg14: memref<2x1x32xf32, #tpu.memory_space<vmem>>, %arg15: memref<2x1x32xf32, #tpu.memory_space<vmem>>, %arg16: memref<2x32x32xbf16, #tpu.memory_space<vmem>>, %arg17: memref<2x32x32xbf16, #tpu.memory_space<vmem>>, %arg18: memref<2x1x32xf32, #tpu.memory_space<vmem>>, %arg19: memref<2x32x32xbf16, #tpu.memory_space<vmem>>, %arg20: memref<2x1x32xf32, #tpu.memory_space<vmem>>, %arg21: memref<32x1xbf16, #tpu.memory_space<vmem>>, %arg22: memref<32x1xbf16, #tpu.memory_space<vmem>>, %arg23: memref<32x1xbf16, #tpu.memory_space<vmem>>, %arg24: memref<1x1xf32, #tpu.memory_space<vmem>>, %arg25: memref<1x1xf32, #tpu.memory_space<vmem>>, %arg26: memref<32x2xf32, #tpu.memory_space<vmem>>) attributes {dimension_semantics = [#tpu.dimension_semantics<arbitrary>], iteration_bounds = array<i64: 1>, scalar_prefetch = 0 : i64, scratch_operands = 0 : i64, tpu.core_type = #tpu.core_type<tc>, window_params = [{pipeline_mode = #tpu.pipeline_mode<synchronous>, transform_indices = @transform_0, window_bounds = array<i64: 32, 1>}, {pipeline_mode = #tpu.pipeline_mode<synchronous>, transform_indices = @transform_1, window_bounds = array<i64: 32, 1>}, {pipeline_mode = #tpu.pipeline_mode<synchronous>, transform_indices = @transform_2, window_bounds = array<i64: 1, 32>}, {pipeline_mode = #tpu.pipeline_mode<synchronous>, transform_indices = @transform_3, window_bounds = array<i64: 16, 4>}, {pipeline_mode = #tpu.pipeline_mode<synchronous>, transform_indices = @transform_4, window_bounds = array<i64: 32, 6>}, {pipeline_mode = #tpu.pipeline_mode<synchronous>, transform_indices = @transform_5, window_bounds = array<i64: 4, 32>}, {pipeline_mode = #tpu.pipeline_mode<synchronous>, transform_indices = @transform_6, window_bounds = array<i64: 1, 32>}, {pipeline_mode = #tpu.pipeline_mode<synchronous>, transform_indices = @transform_7, window_bounds = array<i64: 6, 32>}, {pipeline_mode = #tpu.pipeline_mode<synchronous>, transform_indices = @transform_8, window_bounds = array<i64: 1, 32>}, {pipeline_mode = #tpu.pipeline_mode<synchronous>, transform_indices = @transform_9, window_bounds = array<i64: 32, 32>}, {pipeline_mode = #tpu.pipeline_mode<synchronous>, transform_indices = @transform_10, window_bounds = array<i64: 1, 32>}, {pipeline_mode = #tpu.pipeline_mode<synchronous>, transform_indices = @transform_11, window_bounds = array<i64: 32, 32>}, {pipeline_mode = #tpu.pipeline_mode<synchronous>, transform_indices = @transform_12, window_bounds = array<i64: 1, 32>}, {pipeline_mode = #tpu.pipeline_mode<synchronous>, transform_indices = @transform_13, window_bounds = array<i64: 2, 1, 32>}, {pipeline_mode = #tpu.pipeline_mode<synchronous>, transform_indices = @transform_14, window_bounds = array<i64: 2, 1, 32>}, {pipeline_mode = #tpu.pipeline_mode<synchronous>, transform_indices = @transform_15, window_bounds = array<i64: 2, 32, 32>}, {pipeline_mode = #tpu.pipeline_mode<synchronous>, transform_indices = @transform_16, window_bounds = array<i64: 2, 32, 32>}, {pipeline_mode = #tpu.pipeline_mode<synchronous>, transform_indices = @transform_17, window_bounds = array<i64: 2, 1, 32>}, {pipeline_mode = #tpu.pipeline_mode<synchronous>, transform_indices = @transform_18, window_bounds = array<i64: 2, 32, 32>}, {pipeline_mode = #tpu.pipeline_mode<synchronous>, transform_indices = @transform_19, window_bounds = array<i64: 2, 1, 32>}, {pipeline_mode = #tpu.pipeline_mode<synchronous>, transform_indices = @transform_20, window_bounds = array<i64: 32, 1>}, {pipeline_mode = #tpu.pipeline_mode<synchronous>, transform_indices = @transform_21, window_bounds = array<i64: 32, 1>}, {pipeline_mode = #tpu.pipeline_mode<synchronous>, transform_indices = @transform_22, window_bounds = array<i64: 32, 1>}, {pipeline_mode = #tpu.pipeline_mode<synchronous>, transform_indices = @transform_23, window_bounds = array<i64: 1, 1>}, {pipeline_mode = #tpu.pipeline_mode<synchronous>, transform_indices = @transform_24, window_bounds = array<i64: 1, 1>}, {pipeline_mode = #tpu.pipeline_mode<synchronous>, transform_indices = @transform_25, window_bounds = array<i64: 32, 2>}]} {
    %0 = tpu.iota {dimensions = array<i32: 1>} : vector<32x16xi32>
    %c0 = arith.constant 0 : index
    %c0_0 = arith.constant 0 : index
    %1 = vector.load %arg1[%c0, %c0_0] : memref<32x1xi32, #tpu.memory_space<vmem>>, vector<32x1xi32>
    %2 = vector.broadcast %1 : vector<32x1xi32> to vector<32x16xi32>
    %3 = arith.cmpi eq, %2, %0 : vector<32x16xi32>
    %4 = arith.extui %3 : vector<32x16xi1> to vector<32x16xi32>
    %5 = arith.sitofp %4 : vector<32x16xi32> to vector<32x16xf32>
    %c0_1 = arith.constant 0 : index
    %c0_2 = arith.constant 0 : index
    %6 = vector.load %arg2[%c0_1, %c0_2] : memref<32x1xi32, #tpu.memory_space<vmem>>, vector<32x1xi32>
    %7 = vector.broadcast %6 : vector<32x1xi32> to vector<32x16xi32>
    %8 = arith.cmpi eq, %7, %0 : vector<32x16xi32>
    %9 = arith.extui %8 : vector<32x16xi1> to vector<32x16xi32>
    %10 = arith.sitofp %9 : vector<32x16xi32> to vector<32x16xf32>
    %11 = tpu.iota {dimensions = array<i32: 0>} : vector<16x32xi32>
    %c0_3 = arith.constant 0 : index
    %c0_4 = arith.constant 0 : index
    %12 = vector.load %arg3[%c0_3, %c0_4] : memref<1x32xi32, #tpu.memory_space<vmem>>, vector<1x32xi32>
    %13 = vector.broadcast %12 : vector<1x32xi32> to vector<16x32xi32>
    %14 = arith.cmpi eq, %13, %11 : vector<16x32xi32>
    %15 = arith.extui %14 : vector<16x32xi1> to vector<16x32xi32>
    %16 = arith.sitofp %15 : vector<16x32xi32> to vector<16x32xf32>
    %cst = arith.constant dense<0.000000e+00> : vector<16xf32>
    %17 = vector.multi_reduction <add>, %16, %cst [1] : vector<16x32xf32> to vector<16xf32>
    %18 = vector.shape_cast %17 : vector<16xf32> to vector<16x1xf32>
    %cst_5 = arith.constant 1.000000e+00 : f32
    %19 = vector.broadcast %cst_5 : f32 to vector<16x1xf32>
    %20 = arith.maximumf %18, %19 : vector<16x1xf32>
    %cst_6 = arith.constant 1.000000e+00 : f32
    %21 = vector.broadcast %cst_6 : f32 to vector<16x1xf32>
    %22 = arith.divf %21, %20 : vector<16x1xf32>
    %23 = vector.broadcast %22 : vector<16x1xf32> to vector<16x32xf32>
    %24 = arith.mulf %16, %23 : vector<16x32xf32>
    %c0_7 = arith.constant 0 : index
    %c0_8 = arith.constant 0 : index
    %25 = vector.load %arg4[%c0_7, %c0_8] : memref<16x4xf32, #tpu.memory_space<vmem>>, vector<16x4xf32>
    %c0_9 = arith.constant 0 : index
    %c0_10 = arith.constant 0 : index
    %26 = vector.load %arg6[%c0_9, %c0_10] : memref<4x32xbf16, #tpu.memory_space<vmem>>, vector<4x32xbf16>
    %27 = arith.truncf %25 : vector<16x4xf32> to vector<16x4xbf16>
    %cst_11 = arith.constant dense<0.000000e+00> : vector<16x32xf32>
    %28 = tpu.matmul %27, %26, %cst_11 {dimension_numbers = #tpu.dot_dimension_numbers<[1], [0], [0], [1], [0, 0, 1, 1], [], []>} : vector<16x4xbf16>, vector<4x32xbf16>, vector<16x32xf32> -> vector<16x32xf32>
    %c0_12 = arith.constant 0 : index
    %c0_13 = arith.constant 0 : index
    %29 = vector.load %arg7[%c0_12, %c0_13] : memref<1x32xf32, #tpu.memory_space<vmem>>, vector<1x32xf32>
    %30 = vector.broadcast %29 : vector<1x32xf32> to vector<16x32xf32>
    %31 = arith.addf %28, %30 : vector<16x32xf32>
    %c0_14 = arith.constant 0 : index
    %c0_15 = arith.constant 0 : index
    %32 = vector.load %arg5[%c0_14, %c0_15] : memref<32x6xf32, #tpu.memory_space<vmem>>, vector<32x6xf32>
    %c0_16 = arith.constant 0 : index
    %c0_17 = arith.constant 0 : index
    %33 = vector.load %arg8[%c0_16, %c0_17] : memref<6x32xbf16, #tpu.memory_space<vmem>>, vector<6x32xbf16>
    %34 = arith.truncf %32 : vector<32x6xf32> to vector<32x6xbf16>
    %cst_18 = arith.constant dense<0.000000e+00> : vector<32x32xf32>
    %35 = tpu.matmul %34, %33, %cst_18 {dimension_numbers = #tpu.dot_dimension_numbers<[1], [0], [0], [1], [0, 0, 1, 1], [], []>} : vector<32x6xbf16>, vector<6x32xbf16>, vector<32x32xf32> -> vector<32x32xf32>
    %c0_19 = arith.constant 0 : index
    %c0_20 = arith.constant 0 : index
    %36 = vector.load %arg9[%c0_19, %c0_20] : memref<1x32xf32, #tpu.memory_space<vmem>>, vector<1x32xf32>
    %37 = vector.broadcast %36 : vector<1x32xf32> to vector<32x32xf32>
    %38 = arith.addf %35, %37 : vector<32x32xf32>
    %c0_21 = arith.constant 0 : index
    %c0_22 = arith.constant 0 : index
    %39 = vector.load %arg10[%c0_21, %c0_22] : memref<32x32xbf16, #tpu.memory_space<vmem>>, vector<32x32xbf16>
    %40 = arith.truncf %31 : vector<16x32xf32> to vector<16x32xbf16>
    %cst_23 = arith.constant dense<0.000000e+00> : vector<16x32xf32>
    %41 = tpu.matmul %40, %39, %cst_23 {dimension_numbers = #tpu.dot_dimension_numbers<[1], [0], [0], [1], [0, 0, 1, 1], [], []>} : vector<16x32xbf16>, vector<32x32xbf16>, vector<16x32xf32> -> vector<16x32xf32>
    %c0_24 = arith.constant 0 : index
    %c0_25 = arith.constant 0 : index
    %42 = vector.load %arg11[%c0_24, %c0_25] : memref<1x32xf32, #tpu.memory_space<vmem>>, vector<1x32xf32>
    %43 = vector.broadcast %42 : vector<1x32xf32> to vector<16x32xf32>
    %44 = arith.addf %41, %43 : vector<16x32xf32>
    %cst_26 = arith.constant 0.000000e+00 : f32
    %45 = vector.broadcast %cst_26 : f32 to vector<16x32xf32>
    %46 = arith.maximumf %44, %45 : vector<16x32xf32>
    %c0_27 = arith.constant 0 : index
    %c0_28 = arith.constant 0 : index
    %47 = vector.load %arg12[%c0_27, %c0_28] : memref<32x32xbf16, #tpu.memory_space<vmem>>, vector<32x32xbf16>
    %48 = arith.truncf %38 : vector<32x32xf32> to vector<32x32xbf16>
    %cst_29 = arith.constant dense<0.000000e+00> : vector<32x32xf32>
    %49 = tpu.matmul %48, %47, %cst_29 {dimension_numbers = #tpu.dot_dimension_numbers<[1], [0], [0], [1], [0, 0, 1, 1], [], []>} : vector<32x32xbf16>, vector<32x32xbf16>, vector<32x32xf32> -> vector<32x32xf32>
    %c0_30 = arith.constant 0 : index
    %c0_31 = arith.constant 0 : index
    %50 = vector.load %arg13[%c0_30, %c0_31] : memref<1x32xf32, #tpu.memory_space<vmem>>, vector<1x32xf32>
    %51 = vector.broadcast %50 : vector<1x32xf32> to vector<32x32xf32>
    %52 = arith.addf %49, %51 : vector<32x32xf32>
    %cst_32 = arith.constant 0.000000e+00 : f32
    %53 = vector.broadcast %cst_32 : f32 to vector<32x32xf32>
    %54 = arith.maximumf %52, %53 : vector<32x32xf32>
    %c0_i32 = arith.constant 0 : i32
    %55 = arith.index_cast %c0_i32 : i32 to index
    %c0_33 = arith.constant 0 : index
    %c0_34 = arith.constant 0 : index
    %56 = vector.load %arg14[%55, %c0_33, %c0_34] : memref<2x1x32xf32, #tpu.memory_space<vmem>>, vector<1x1x32xf32>
    %57 = vector.shape_cast %56 : vector<1x1x32xf32> to vector<1x32xf32>
    %58 = arith.index_cast %c0_i32 : i32 to index
    %c0_35 = arith.constant 0 : index
    %c0_36 = arith.constant 0 : index
    %59 = vector.load %arg15[%58, %c0_35, %c0_36] : memref<2x1x32xf32, #tpu.memory_space<vmem>>, vector<1x1x32xf32>
    %60 = vector.shape_cast %59 : vector<1x1x32xf32> to vector<1x32xf32>
    %cst_37 = arith.constant dense<0.000000e+00> : vector<16xf32>
    %61 = vector.multi_reduction <add>, %46, %cst_37 [1] : vector<16x32xf32> to vector<16xf32>
    %62 = vector.shape_cast %61 : vector<16xf32> to vector<16x1xf32>
    %cst_38 = arith.constant 3.125000e-02 : f32
    %63 = vector.broadcast %cst_38 : f32 to vector<16x1xf32>
    %64 = arith.mulf %62, %63 : vector<16x1xf32>
    %65 = vector.broadcast %64 : vector<16x1xf32> to vector<16x32xf32>
    %66 = arith.subf %46, %65 : vector<16x32xf32>
    %67 = arith.mulf %66, %66 : vector<16x32xf32>
    %cst_39 = arith.constant dense<0.000000e+00> : vector<16xf32>
    %68 = vector.multi_reduction <add>, %67, %cst_39 [1] : vector<16x32xf32> to vector<16xf32>
    %69 = vector.shape_cast %68 : vector<16xf32> to vector<16x1xf32>
    %cst_40 = arith.constant 3.125000e-02 : f32
    %70 = vector.broadcast %cst_40 : f32 to vector<16x1xf32>
    %71 = arith.mulf %69, %70 : vector<16x1xf32>
    %cst_41 = arith.constant 9.99999974E-6 : f32
    %72 = vector.broadcast %cst_41 : f32 to vector<16x1xf32>
    %73 = arith.addf %71, %72 : vector<16x1xf32>
    %74 = math.rsqrt %73 : vector<16x1xf32>
    %75 = vector.broadcast %74 : vector<16x1xf32> to vector<16x32xf32>
    %76 = arith.mulf %66, %75 : vector<16x32xf32>
    %77 = vector.broadcast %57 : vector<1x32xf32> to vector<16x32xf32>
    %78 = arith.mulf %76, %77 : vector<16x32xf32>
    %79 = vector.broadcast %60 : vector<1x32xf32> to vector<16x32xf32>
    %80 = arith.addf %78, %79 : vector<16x32xf32>
    %cst_42 = arith.constant 0.000000e+00 : f32
    %81 = vector.broadcast %cst_42 : f32 to vector<16x32xf32>
    %82 = arith.maximumf %80, %81 : vector<16x32xf32>
    %cst_43 = arith.constant dense<0.000000e+00> : vector<32xf32>
    %83 = vector.multi_reduction <add>, %54, %cst_43 [1] : vector<32x32xf32> to vector<32xf32>
    %84 = vector.shape_cast %83 : vector<32xf32> to vector<32x1xf32>
    %cst_44 = arith.constant 3.125000e-02 : f32
    %85 = vector.broadcast %cst_44 : f32 to vector<32x1xf32>
    %86 = arith.mulf %84, %85 : vector<32x1xf32>
    %87 = vector.broadcast %86 : vector<32x1xf32> to vector<32x32xf32>
    %88 = arith.subf %54, %87 : vector<32x32xf32>
    %89 = arith.mulf %88, %88 : vector<32x32xf32>
    %cst_45 = arith.constant dense<0.000000e+00> : vector<32xf32>
    %90 = vector.multi_reduction <add>, %89, %cst_45 [1] : vector<32x32xf32> to vector<32xf32>
    %91 = vector.shape_cast %90 : vector<32xf32> to vector<32x1xf32>
    %cst_46 = arith.constant 3.125000e-02 : f32
    %92 = vector.broadcast %cst_46 : f32 to vector<32x1xf32>
    %93 = arith.mulf %91, %92 : vector<32x1xf32>
    %cst_47 = arith.constant 9.99999974E-6 : f32
    %94 = vector.broadcast %cst_47 : f32 to vector<32x1xf32>
    %95 = arith.addf %93, %94 : vector<32x1xf32>
    %96 = math.rsqrt %95 : vector<32x1xf32>
    %97 = vector.broadcast %96 : vector<32x1xf32> to vector<32x32xf32>
    %98 = arith.mulf %88, %97 : vector<32x32xf32>
    %99 = vector.broadcast %57 : vector<1x32xf32> to vector<32x32xf32>
    %100 = arith.mulf %98, %99 : vector<32x32xf32>
    %101 = vector.broadcast %60 : vector<1x32xf32> to vector<32x32xf32>
    %102 = arith.addf %100, %101 : vector<32x32xf32>
    %cst_48 = arith.constant 0.000000e+00 : f32
    %103 = vector.broadcast %cst_48 : f32 to vector<32x32xf32>
    %104 = arith.maximumf %102, %103 : vector<32x32xf32>
    %105 = arith.index_cast %c0_i32 : i32 to index
    %c0_49 = arith.constant 0 : index
    %c0_50 = arith.constant 0 : index
    %106 = vector.load %arg16[%105, %c0_49, %c0_50] : memref<2x32x32xbf16, #tpu.memory_space<vmem>>, vector<1x32x32xbf16>
    %107 = vector.shape_cast %106 : vector<1x32x32xbf16> to vector<32x32xbf16>
    %108 = arith.truncf %82 : vector<16x32xf32> to vector<16x32xbf16>
    %cst_51 = arith.constant dense<0.000000e+00> : vector<16x32xf32>
    %109 = tpu.matmul %108, %107, %cst_51 {dimension_numbers = #tpu.dot_dimension_numbers<[1], [0], [0], [1], [0, 0, 1, 1], [], []>} : vector<16x32xbf16>, vector<32x32xbf16>, vector<16x32xf32> -> vector<16x32xf32>
    %cst_52 = arith.constant dense<0.000000e+00> : vector<32x32xf32>
    %110 = tpu.matmul %5, %109, %cst_52 {dimension_numbers = #tpu.dot_dimension_numbers<[1], [0], [0], [1], [0, 0, 1, 1], [], []>} : vector<32x16xf32>, vector<16x32xf32>, vector<32x32xf32> -> vector<32x32xf32>
    %111 = arith.index_cast %c0_i32 : i32 to index
    %c0_53 = arith.constant 0 : index
    %c0_54 = arith.constant 0 : index
    %112 = vector.load %arg17[%111, %c0_53, %c0_54] : memref<2x32x32xbf16, #tpu.memory_space<vmem>>, vector<1x32x32xbf16>
    %113 = vector.shape_cast %112 : vector<1x32x32xbf16> to vector<32x32xbf16>
    %114 = arith.truncf %104 : vector<32x32xf32> to vector<32x32xbf16>
    %cst_55 = arith.constant dense<0.000000e+00> : vector<32x32xf32>
    %115 = tpu.matmul %114, %113, %cst_55 {dimension_numbers = #tpu.dot_dimension_numbers<[1], [0], [0], [1], [0, 0, 1, 1], [], []>} : vector<32x32xbf16>, vector<32x32xbf16>, vector<32x32xf32> -> vector<32x32xf32>
    %116 = arith.addf %110, %115 : vector<32x32xf32>
    %117 = arith.index_cast %c0_i32 : i32 to index
    %c0_56 = arith.constant 0 : index
    %c0_57 = arith.constant 0 : index
    %118 = vector.load %arg18[%117, %c0_56, %c0_57] : memref<2x1x32xf32, #tpu.memory_space<vmem>>, vector<1x1x32xf32>
    %119 = vector.shape_cast %118 : vector<1x1x32xf32> to vector<1x32xf32>
    %120 = vector.broadcast %119 : vector<1x32xf32> to vector<32x32xf32>
    %121 = arith.addf %116, %120 : vector<32x32xf32>
    %cst_58 = arith.constant 0.000000e+00 : f32
    %122 = vector.broadcast %cst_58 : f32 to vector<32x32xf32>
    %123 = arith.maximumf %121, %122 : vector<32x32xf32>
    %cst_59 = arith.constant dense<0.000000e+00> : vector<16x32xf32>
    %124 = tpu.matmul %24, %123, %cst_59 {dimension_numbers = #tpu.dot_dimension_numbers<[1], [0], [0], [1], [0, 0, 1, 1], [], []>} : vector<16x32xf32>, vector<32x32xf32>, vector<16x32xf32> -> vector<16x32xf32>
    %125 = arith.index_cast %c0_i32 : i32 to index
    %c0_60 = arith.constant 0 : index
    %c0_61 = arith.constant 0 : index
    %126 = vector.load %arg19[%125, %c0_60, %c0_61] : memref<2x32x32xbf16, #tpu.memory_space<vmem>>, vector<1x32x32xbf16>
    %127 = vector.shape_cast %126 : vector<1x32x32xbf16> to vector<32x32xbf16>
    %128 = arith.truncf %124 : vector<16x32xf32> to vector<16x32xbf16>
    %cst_62 = arith.constant dense<0.000000e+00> : vector<16x32xf32>
    %129 = tpu.matmul %128, %127, %cst_62 {dimension_numbers = #tpu.dot_dimension_numbers<[1], [0], [0], [1], [0, 0, 1, 1], [], []>} : vector<16x32xbf16>, vector<32x32xbf16>, vector<16x32xf32> -> vector<16x32xf32>
    %130 = arith.index_cast %c0_i32 : i32 to index
    %c0_63 = arith.constant 0 : index
    %c0_64 = arith.constant 0 : index
    %131 = vector.load %arg20[%130, %c0_63, %c0_64] : memref<2x1x32xf32, #tpu.memory_space<vmem>>, vector<1x1x32xf32>
    %132 = vector.shape_cast %131 : vector<1x1x32xf32> to vector<1x32xf32>
    %133 = vector.broadcast %132 : vector<1x32xf32> to vector<16x32xf32>
    %134 = arith.addf %129, %133 : vector<16x32xf32>
    %135 = arith.addf %46, %134 : vector<16x32xf32>
    %136 = arith.addf %54, %123 : vector<32x32xf32>
    %c1_i32 = arith.constant 1 : i32
    %137 = arith.index_cast %c1_i32 : i32 to index
    %c0_65 = arith.constant 0 : index
    %c0_66 = arith.constant 0 : index
    %138 = vector.load %arg14[%137, %c0_65, %c0_66] : memref<2x1x32xf32, #tpu.memory_space<vmem>>, vector<1x1x32xf32>
    %139 = vector.shape_cast %138 : vector<1x1x32xf32> to vector<1x32xf32>
    %140 = arith.index_cast %c1_i32 : i32 to index
    %c0_67 = arith.constant 0 : index
    %c0_68 = arith.constant 0 : index
    %141 = vector.load %arg15[%140, %c0_67, %c0_68] : memref<2x1x32xf32, #tpu.memory_space<vmem>>, vector<1x1x32xf32>
    %142 = vector.shape_cast %141 : vector<1x1x32xf32> to vector<1x32xf32>
    %cst_69 = arith.constant dense<0.000000e+00> : vector<16xf32>
    %143 = vector.multi_reduction <add>, %135, %cst_69 [1] : vector<16x32xf32> to vector<16xf32>
    %144 = vector.shape_cast %143 : vector<16xf32> to vector<16x1xf32>
    %cst_70 = arith.constant 3.125000e-02 : f32
    %145 = vector.broadcast %cst_70 : f32 to vector<16x1xf32>
    %146 = arith.mulf %144, %145 : vector<16x1xf32>
    %147 = vector.broadcast %146 : vector<16x1xf32> to vector<16x32xf32>
    %148 = arith.subf %135, %147 : vector<16x32xf32>
    %149 = arith.mulf %148, %148 : vector<16x32xf32>
    %cst_71 = arith.constant dense<0.000000e+00> : vector<16xf32>
    %150 = vector.multi_reduction <add>, %149, %cst_71 [1] : vector<16x32xf32> to vector<16xf32>
    %151 = vector.shape_cast %150 : vector<16xf32> to vector<16x1xf32>
    %cst_72 = arith.constant 3.125000e-02 : f32
    %152 = vector.broadcast %cst_72 : f32 to vector<16x1xf32>
    %153 = arith.mulf %151, %152 : vector<16x1xf32>
    %cst_73 = arith.constant 9.99999974E-6 : f32
    %154 = vector.broadcast %cst_73 : f32 to vector<16x1xf32>
    %155 = arith.addf %153, %154 : vector<16x1xf32>
    %156 = math.rsqrt %155 : vector<16x1xf32>
    %157 = vector.broadcast %156 : vector<16x1xf32> to vector<16x32xf32>
    %158 = arith.mulf %148, %157 : vector<16x32xf32>
    %159 = vector.broadcast %139 : vector<1x32xf32> to vector<16x32xf32>
    %160 = arith.mulf %158, %159 : vector<16x32xf32>
    %161 = vector.broadcast %142 : vector<1x32xf32> to vector<16x32xf32>
    %162 = arith.addf %160, %161 : vector<16x32xf32>
    %cst_74 = arith.constant 0.000000e+00 : f32
    %163 = vector.broadcast %cst_74 : f32 to vector<16x32xf32>
    %164 = arith.maximumf %162, %163 : vector<16x32xf32>
    %cst_75 = arith.constant dense<0.000000e+00> : vector<32xf32>
    %165 = vector.multi_reduction <add>, %136, %cst_75 [1] : vector<32x32xf32> to vector<32xf32>
    %166 = vector.shape_cast %165 : vector<32xf32> to vector<32x1xf32>
    %cst_76 = arith.constant 3.125000e-02 : f32
    %167 = vector.broadcast %cst_76 : f32 to vector<32x1xf32>
    %168 = arith.mulf %166, %167 : vector<32x1xf32>
    %169 = vector.broadcast %168 : vector<32x1xf32> to vector<32x32xf32>
    %170 = arith.subf %136, %169 : vector<32x32xf32>
    %171 = arith.mulf %170, %170 : vector<32x32xf32>
    %cst_77 = arith.constant dense<0.000000e+00> : vector<32xf32>
    %172 = vector.multi_reduction <add>, %171, %cst_77 [1] : vector<32x32xf32> to vector<32xf32>
    %173 = vector.shape_cast %172 : vector<32xf32> to vector<32x1xf32>
    %cst_78 = arith.constant 3.125000e-02 : f32
    %174 = vector.broadcast %cst_78 : f32 to vector<32x1xf32>
    %175 = arith.mulf %173, %174 : vector<32x1xf32>
    %cst_79 = arith.constant 9.99999974E-6 : f32
    %176 = vector.broadcast %cst_79 : f32 to vector<32x1xf32>
    %177 = arith.addf %175, %176 : vector<32x1xf32>
    %178 = math.rsqrt %177 : vector<32x1xf32>
    %179 = vector.broadcast %178 : vector<32x1xf32> to vector<32x32xf32>
    %180 = arith.mulf %170, %179 : vector<32x32xf32>
    %181 = vector.broadcast %139 : vector<1x32xf32> to vector<32x32xf32>
    %182 = arith.mulf %180, %181 : vector<32x32xf32>
    %183 = vector.broadcast %142 : vector<1x32xf32> to vector<32x32xf32>
    %184 = arith.addf %182, %183 : vector<32x32xf32>
    %cst_80 = arith.constant 0.000000e+00 : f32
    %185 = vector.broadcast %cst_80 : f32 to vector<32x32xf32>
    %186 = arith.maximumf %184, %185 : vector<32x32xf32>
    %187 = arith.index_cast %c1_i32 : i32 to index
    %c0_81 = arith.constant 0 : index
    %c0_82 = arith.constant 0 : index
    %188 = vector.load %arg16[%187, %c0_81, %c0_82] : memref<2x32x32xbf16, #tpu.memory_space<vmem>>, vector<1x32x32xbf16>
    %189 = vector.shape_cast %188 : vector<1x32x32xbf16> to vector<32x32xbf16>
    %190 = arith.truncf %164 : vector<16x32xf32> to vector<16x32xbf16>
    %cst_83 = arith.constant dense<0.000000e+00> : vector<16x32xf32>
    %191 = tpu.matmul %190, %189, %cst_83 {dimension_numbers = #tpu.dot_dimension_numbers<[1], [0], [0], [1], [0, 0, 1, 1], [], []>} : vector<16x32xbf16>, vector<32x32xbf16>, vector<16x32xf32> -> vector<16x32xf32>
    %cst_84 = arith.constant dense<0.000000e+00> : vector<32x32xf32>
    %192 = tpu.matmul %5, %191, %cst_84 {dimension_numbers = #tpu.dot_dimension_numbers<[1], [0], [0], [1], [0, 0, 1, 1], [], []>} : vector<32x16xf32>, vector<16x32xf32>, vector<32x32xf32> -> vector<32x32xf32>
    %193 = arith.index_cast %c1_i32 : i32 to index
    %c0_85 = arith.constant 0 : index
    %c0_86 = arith.constant 0 : index
    %194 = vector.load %arg17[%193, %c0_85, %c0_86] : memref<2x32x32xbf16, #tpu.memory_space<vmem>>, vector<1x32x32xbf16>
    %195 = vector.shape_cast %194 : vector<1x32x32xbf16> to vector<32x32xbf16>
    %196 = arith.truncf %186 : vector<32x32xf32> to vector<32x32xbf16>
    %cst_87 = arith.constant dense<0.000000e+00> : vector<32x32xf32>
    %197 = tpu.matmul %196, %195, %cst_87 {dimension_numbers = #tpu.dot_dimension_numbers<[1], [0], [0], [1], [0, 0, 1, 1], [], []>} : vector<32x32xbf16>, vector<32x32xbf16>, vector<32x32xf32> -> vector<32x32xf32>
    %198 = arith.addf %192, %197 : vector<32x32xf32>
    %199 = arith.index_cast %c1_i32 : i32 to index
    %c0_88 = arith.constant 0 : index
    %c0_89 = arith.constant 0 : index
    %200 = vector.load %arg18[%199, %c0_88, %c0_89] : memref<2x1x32xf32, #tpu.memory_space<vmem>>, vector<1x1x32xf32>
    %201 = vector.shape_cast %200 : vector<1x1x32xf32> to vector<1x32xf32>
    %202 = vector.broadcast %201 : vector<1x32xf32> to vector<32x32xf32>
    %203 = arith.addf %198, %202 : vector<32x32xf32>
    %cst_90 = arith.constant 0.000000e+00 : f32
    %204 = vector.broadcast %cst_90 : f32 to vector<32x32xf32>
    %205 = arith.maximumf %203, %204 : vector<32x32xf32>
    %cst_91 = arith.constant dense<0.000000e+00> : vector<16x32xf32>
    %206 = tpu.matmul %24, %205, %cst_91 {dimension_numbers = #tpu.dot_dimension_numbers<[1], [0], [0], [1], [0, 0, 1, 1], [], []>} : vector<16x32xf32>, vector<32x32xf32>, vector<16x32xf32> -> vector<16x32xf32>
    %207 = arith.index_cast %c1_i32 : i32 to index
    %c0_92 = arith.constant 0 : index
    %c0_93 = arith.constant 0 : index
    %208 = vector.load %arg19[%207, %c0_92, %c0_93] : memref<2x32x32xbf16, #tpu.memory_space<vmem>>, vector<1x32x32xbf16>
    %209 = vector.shape_cast %208 : vector<1x32x32xbf16> to vector<32x32xbf16>
    %210 = arith.truncf %206 : vector<16x32xf32> to vector<16x32xbf16>
    %cst_94 = arith.constant dense<0.000000e+00> : vector<16x32xf32>
    %211 = tpu.matmul %210, %209, %cst_94 {dimension_numbers = #tpu.dot_dimension_numbers<[1], [0], [0], [1], [0, 0, 1, 1], [], []>} : vector<16x32xbf16>, vector<32x32xbf16>, vector<16x32xf32> -> vector<16x32xf32>
    %212 = arith.index_cast %c1_i32 : i32 to index
    %c0_95 = arith.constant 0 : index
    %c0_96 = arith.constant 0 : index
    %213 = vector.load %arg20[%212, %c0_95, %c0_96] : memref<2x1x32xf32, #tpu.memory_space<vmem>>, vector<1x1x32xf32>
    %214 = vector.shape_cast %213 : vector<1x1x32xf32> to vector<1x32xf32>
    %215 = vector.broadcast %214 : vector<1x32xf32> to vector<16x32xf32>
    %216 = arith.addf %211, %215 : vector<16x32xf32>
    %217 = arith.addf %135, %216 : vector<16x32xf32>
    %218 = arith.addf %136, %205 : vector<32x32xf32>
    %c2_i32 = arith.constant 2 : i32
    %c0_97 = arith.constant 0 : index
    %c0_98 = arith.constant 0 : index
    %c0_99 = arith.constant 0 : index
    %219 = vector.load %arg14[%c0_97, %c0_98, %c0_99] : memref<2x1x32xf32, #tpu.memory_space<vmem>>, vector<1x1x32xf32>
    %220 = vector.shape_cast %219 : vector<1x1x32xf32> to vector<1x32xf32>
    %c0_100 = arith.constant 0 : index
    %c0_101 = arith.constant 0 : index
    %c0_102 = arith.constant 0 : index
    %221 = vector.load %arg15[%c0_100, %c0_101, %c0_102] : memref<2x1x32xf32, #tpu.memory_space<vmem>>, vector<1x1x32xf32>
    %222 = vector.shape_cast %221 : vector<1x1x32xf32> to vector<1x32xf32>
    %cst_103 = arith.constant dense<0.000000e+00> : vector<16xf32>
    %223 = vector.multi_reduction <add>, %217, %cst_103 [1] : vector<16x32xf32> to vector<16xf32>
    %224 = vector.shape_cast %223 : vector<16xf32> to vector<16x1xf32>
    %cst_104 = arith.constant 3.125000e-02 : f32
    %225 = vector.broadcast %cst_104 : f32 to vector<16x1xf32>
    %226 = arith.mulf %224, %225 : vector<16x1xf32>
    %227 = vector.broadcast %226 : vector<16x1xf32> to vector<16x32xf32>
    %228 = arith.subf %217, %227 : vector<16x32xf32>
    %229 = arith.mulf %228, %228 : vector<16x32xf32>
    %cst_105 = arith.constant dense<0.000000e+00> : vector<16xf32>
    %230 = vector.multi_reduction <add>, %229, %cst_105 [1] : vector<16x32xf32> to vector<16xf32>
    %231 = vector.shape_cast %230 : vector<16xf32> to vector<16x1xf32>
    %cst_106 = arith.constant 3.125000e-02 : f32
    %232 = vector.broadcast %cst_106 : f32 to vector<16x1xf32>
    %233 = arith.mulf %231, %232 : vector<16x1xf32>
    %cst_107 = arith.constant 9.99999974E-6 : f32
    %234 = vector.broadcast %cst_107 : f32 to vector<16x1xf32>
    %235 = arith.addf %233, %234 : vector<16x1xf32>
    %236 = math.rsqrt %235 : vector<16x1xf32>
    %237 = vector.broadcast %236 : vector<16x1xf32> to vector<16x32xf32>
    %238 = arith.mulf %228, %237 : vector<16x32xf32>
    %239 = vector.broadcast %220 : vector<1x32xf32> to vector<16x32xf32>
    %240 = arith.mulf %238, %239 : vector<16x32xf32>
    %241 = vector.broadcast %222 : vector<1x32xf32> to vector<16x32xf32>
    %242 = arith.addf %240, %241 : vector<16x32xf32>
    %cst_108 = arith.constant 0.000000e+00 : f32
    %243 = vector.broadcast %cst_108 : f32 to vector<16x32xf32>
    %244 = arith.maximumf %242, %243 : vector<16x32xf32>
    %cst_109 = arith.constant dense<0.000000e+00> : vector<32xf32>
    %245 = vector.multi_reduction <add>, %218, %cst_109 [1] : vector<32x32xf32> to vector<32xf32>
    %246 = vector.shape_cast %245 : vector<32xf32> to vector<32x1xf32>
    %cst_110 = arith.constant 3.125000e-02 : f32
    %247 = vector.broadcast %cst_110 : f32 to vector<32x1xf32>
    %248 = arith.mulf %246, %247 : vector<32x1xf32>
    %249 = vector.broadcast %248 : vector<32x1xf32> to vector<32x32xf32>
    %250 = arith.subf %218, %249 : vector<32x32xf32>
    %251 = arith.mulf %250, %250 : vector<32x32xf32>
    %cst_111 = arith.constant dense<0.000000e+00> : vector<32xf32>
    %252 = vector.multi_reduction <add>, %251, %cst_111 [1] : vector<32x32xf32> to vector<32xf32>
    %253 = vector.shape_cast %252 : vector<32xf32> to vector<32x1xf32>
    %cst_112 = arith.constant 3.125000e-02 : f32
    %254 = vector.broadcast %cst_112 : f32 to vector<32x1xf32>
    %255 = arith.mulf %253, %254 : vector<32x1xf32>
    %cst_113 = arith.constant 9.99999974E-6 : f32
    %256 = vector.broadcast %cst_113 : f32 to vector<32x1xf32>
    %257 = arith.addf %255, %256 : vector<32x1xf32>
    %258 = math.rsqrt %257 : vector<32x1xf32>
    %259 = vector.broadcast %258 : vector<32x1xf32> to vector<32x32xf32>
    %260 = arith.mulf %250, %259 : vector<32x32xf32>
    %261 = vector.broadcast %220 : vector<1x32xf32> to vector<32x32xf32>
    %262 = arith.mulf %260, %261 : vector<32x32xf32>
    %263 = vector.broadcast %222 : vector<1x32xf32> to vector<32x32xf32>
    %264 = arith.addf %262, %263 : vector<32x32xf32>
    %cst_114 = arith.constant 0.000000e+00 : f32
    %265 = vector.broadcast %cst_114 : f32 to vector<32x32xf32>
    %266 = arith.maximumf %264, %265 : vector<32x32xf32>
    %c0_115 = arith.constant 0 : index
    %c0_116 = arith.constant 0 : index
    %267 = vector.load %arg21[%c0_115, %c0_116] : memref<32x1xbf16, #tpu.memory_space<vmem>>, vector<32x1xbf16>
    %268 = arith.truncf %244 : vector<16x32xf32> to vector<16x32xbf16>
    %cst_117 = arith.constant dense<0.000000e+00> : vector<16x1xf32>
    %269 = tpu.matmul %268, %267, %cst_117 {dimension_numbers = #tpu.dot_dimension_numbers<[1], [0], [0], [1], [0, 0, 1, 1], [], []>} : vector<16x32xbf16>, vector<32x1xbf16>, vector<16x1xf32> -> vector<16x1xf32>
    %c0_118 = arith.constant 0 : index
    %c0_119 = arith.constant 0 : index
    %270 = vector.load %arg22[%c0_118, %c0_119] : memref<32x1xbf16, #tpu.memory_space<vmem>>, vector<32x1xbf16>
    %271 = arith.truncf %244 : vector<16x32xf32> to vector<16x32xbf16>
    %cst_120 = arith.constant dense<0.000000e+00> : vector<16x1xf32>
    %272 = tpu.matmul %271, %270, %cst_120 {dimension_numbers = #tpu.dot_dimension_numbers<[1], [0], [0], [1], [0, 0, 1, 1], [], []>} : vector<16x32xbf16>, vector<32x1xbf16>, vector<16x1xf32> -> vector<16x1xf32>
    %cst_121 = arith.constant dense<0.000000e+00> : vector<32x1xf32>
    %273 = tpu.matmul %5, %269, %cst_121 {dimension_numbers = #tpu.dot_dimension_numbers<[1], [0], [0], [1], [0, 0, 1, 1], [], []>} : vector<32x16xf32>, vector<16x1xf32>, vector<32x1xf32> -> vector<32x1xf32>
    %cst_122 = arith.constant dense<0.000000e+00> : vector<32x1xf32>
    %274 = tpu.matmul %10, %272, %cst_122 {dimension_numbers = #tpu.dot_dimension_numbers<[1], [0], [0], [1], [0, 0, 1, 1], [], []>} : vector<32x16xf32>, vector<16x1xf32>, vector<32x1xf32> -> vector<32x1xf32>
    %275 = arith.addf %273, %274 : vector<32x1xf32>
    %c0_123 = arith.constant 0 : index
    %c0_124 = arith.constant 0 : index
    %276 = vector.load %arg23[%c0_123, %c0_124] : memref<32x1xbf16, #tpu.memory_space<vmem>>, vector<32x1xbf16>
    %277 = arith.truncf %266 : vector<32x32xf32> to vector<32x32xbf16>
    %cst_125 = arith.constant dense<0.000000e+00> : vector<32x1xf32>
    %278 = tpu.matmul %277, %276, %cst_125 {dimension_numbers = #tpu.dot_dimension_numbers<[1], [0], [0], [1], [0, 0, 1, 1], [], []>} : vector<32x32xbf16>, vector<32x1xbf16>, vector<32x1xf32> -> vector<32x1xf32>
    %279 = arith.addf %275, %278 : vector<32x1xf32>
    %c0_126 = arith.constant 0 : index
    %c0_127 = arith.constant 0 : index
    %280 = vector.load %arg24[%c0_126, %c0_127] : memref<1x1xf32, #tpu.memory_space<vmem>>, vector<1x1xf32>
    %281 = vector.broadcast %280 : vector<1x1xf32> to vector<32x1xf32>
    %282 = arith.addf %279, %281 : vector<32x1xf32>
    %cst_128 = arith.constant 0.000000e+00 : f32
    %283 = vector.broadcast %cst_128 : f32 to vector<32x1xf32>
    %284 = arith.maximumf %282, %283 : vector<32x1xf32>
    %c0_129 = arith.constant 0 : index
    %c0_130 = arith.constant 0 : index
    %285 = vector.load %arg25[%c0_129, %c0_130] : memref<1x1xf32, #tpu.memory_space<vmem>>, vector<1x1xf32>
    %286 = tpu.iota {dimensions = array<i32: 1>} : vector<32x2xi32>
    %c1_i32_131 = arith.constant 1 : i32
    %287 = vector.broadcast %c1_i32_131 : i32 to vector<32x2xi32>
    %288 = arith.cmpi slt, %286, %287 : vector<32x2xi32>
    %289 = vector.shape_cast %284 : vector<32x1xf32> to vector<32x1xf32>
    %290 = vector.broadcast %289 : vector<32x1xf32> to vector<32x2xf32>
    %291 = vector.shape_cast %285 : vector<1x1xf32> to vector<1x1xf32>
    %292 = vector.broadcast %291 : vector<1x1xf32> to vector<32x2xf32>
    %293 = arith.select %288, %290, %292 : vector<32x2xi1>, vector<32x2xf32>
    %c0_132 = arith.constant 0 : index
    %c0_133 = arith.constant 0 : index
    %294 = vector.load %arg26[%c0_132, %c0_133] : memref<32x2xf32, #tpu.memory_space<vmem>>, vector<32x2xf32>
    tpu.vector_store %arg26[%c0_132, %c0_133], %293 {strides = array<i32>} : memref<32x2xf32, #tpu.memory_space<vmem>>, vector<32x2xf32>,
    return
  }
  func.func @transform_0(%arg0: i32) -> (i32, i32) {
    %c0_i32 = arith.constant 0 : i32
    %c0_i32_0 = arith.constant 0 : i32
    %c0_i32_1 = arith.constant 0 : i32
    return %c0_i32, %c0_i32_0 : i32, i32
  }
  func.func @transform_1(%arg0: i32) -> (i32, i32) {
    %c0_i32 = arith.constant 0 : i32
    %c0_i32_0 = arith.constant 0 : i32
    %c0_i32_1 = arith.constant 0 : i32
    return %c0_i32, %c0_i32_0 : i32, i32
  }
  func.func @transform_2(%arg0: i32) -> (i32, i32) {
    %c0_i32 = arith.constant 0 : i32
    %c0_i32_0 = arith.constant 0 : i32
    %c0_i32_1 = arith.constant 0 : i32
    return %c0_i32, %c0_i32_0 : i32, i32
  }
  func.func @transform_3(%arg0: i32) -> (i32, i32) {
    %c0_i32 = arith.constant 0 : i32
    %c0_i32_0 = arith.constant 0 : i32
    %c0_i32_1 = arith.constant 0 : i32
    return %c0_i32, %c0_i32_0 : i32, i32
  }
  func.func @transform_4(%arg0: i32) -> (i32, i32) {
    %c0_i32 = arith.constant 0 : i32
    %c0_i32_0 = arith.constant 0 : i32
    %c0_i32_1 = arith.constant 0 : i32
    return %c0_i32, %c0_i32_0 : i32, i32
  }
  func.func @transform_5(%arg0: i32) -> (i32, i32) {
    %c0_i32 = arith.constant 0 : i32
    %c0_i32_0 = arith.constant 0 : i32
    %c0_i32_1 = arith.constant 0 : i32
    return %c0_i32, %c0_i32_0 : i32, i32
  }
  func.func @transform_6(%arg0: i32) -> (i32, i32) {
    %c0_i32 = arith.constant 0 : i32
    %c0_i32_0 = arith.constant 0 : i32
    %c0_i32_1 = arith.constant 0 : i32
    return %c0_i32, %c0_i32_0 : i32, i32
  }
  func.func @transform_7(%arg0: i32) -> (i32, i32) {
    %c0_i32 = arith.constant 0 : i32
    %c0_i32_0 = arith.constant 0 : i32
    %c0_i32_1 = arith.constant 0 : i32
    return %c0_i32, %c0_i32_0 : i32, i32
  }
  func.func @transform_8(%arg0: i32) -> (i32, i32) {
    %c0_i32 = arith.constant 0 : i32
    %c0_i32_0 = arith.constant 0 : i32
    %c0_i32_1 = arith.constant 0 : i32
    return %c0_i32, %c0_i32_0 : i32, i32
  }
  func.func @transform_9(%arg0: i32) -> (i32, i32) {
    %c0_i32 = arith.constant 0 : i32
    %c0_i32_0 = arith.constant 0 : i32
    %c0_i32_1 = arith.constant 0 : i32
    return %c0_i32, %c0_i32_0 : i32, i32
  }
  func.func @transform_10(%arg0: i32) -> (i32, i32) {
    %c0_i32 = arith.constant 0 : i32
    %c0_i32_0 = arith.constant 0 : i32
    %c0_i32_1 = arith.constant 0 : i32
    return %c0_i32, %c0_i32_0 : i32, i32
  }
  func.func @transform_11(%arg0: i32) -> (i32, i32) {
    %c0_i32 = arith.constant 0 : i32
    %c0_i32_0 = arith.constant 0 : i32
    %c0_i32_1 = arith.constant 0 : i32
    return %c0_i32, %c0_i32_0 : i32, i32
  }
  func.func @transform_12(%arg0: i32) -> (i32, i32) {
    %c0_i32 = arith.constant 0 : i32
    %c0_i32_0 = arith.constant 0 : i32
    %c0_i32_1 = arith.constant 0 : i32
    return %c0_i32, %c0_i32_0 : i32, i32
  }
  func.func @transform_13(%arg0: i32) -> (i32, i32, i32) {
    %c0_i32 = arith.constant 0 : i32
    %c0_i32_0 = arith.constant 0 : i32
    %c0_i32_1 = arith.constant 0 : i32
    %c0_i32_2 = arith.constant 0 : i32
    return %c0_i32, %c0_i32_0, %c0_i32_1 : i32, i32, i32
  }
  func.func @transform_14(%arg0: i32) -> (i32, i32, i32) {
    %c0_i32 = arith.constant 0 : i32
    %c0_i32_0 = arith.constant 0 : i32
    %c0_i32_1 = arith.constant 0 : i32
    %c0_i32_2 = arith.constant 0 : i32
    return %c0_i32, %c0_i32_0, %c0_i32_1 : i32, i32, i32
  }
  func.func @transform_15(%arg0: i32) -> (i32, i32, i32) {
    %c0_i32 = arith.constant 0 : i32
    %c0_i32_0 = arith.constant 0 : i32
    %c0_i32_1 = arith.constant 0 : i32
    %c0_i32_2 = arith.constant 0 : i32
    return %c0_i32, %c0_i32_0, %c0_i32_1 : i32, i32, i32
  }
  func.func @transform_16(%arg0: i32) -> (i32, i32, i32) {
    %c0_i32 = arith.constant 0 : i32
    %c0_i32_0 = arith.constant 0 : i32
    %c0_i32_1 = arith.constant 0 : i32
    %c0_i32_2 = arith.constant 0 : i32
    return %c0_i32, %c0_i32_0, %c0_i32_1 : i32, i32, i32
  }
  func.func @transform_17(%arg0: i32) -> (i32, i32, i32) {
    %c0_i32 = arith.constant 0 : i32
    %c0_i32_0 = arith.constant 0 : i32
    %c0_i32_1 = arith.constant 0 : i32
    %c0_i32_2 = arith.constant 0 : i32
    return %c0_i32, %c0_i32_0, %c0_i32_1 : i32, i32, i32
  }
  func.func @transform_18(%arg0: i32) -> (i32, i32, i32) {
    %c0_i32 = arith.constant 0 : i32
    %c0_i32_0 = arith.constant 0 : i32
    %c0_i32_1 = arith.constant 0 : i32
    %c0_i32_2 = arith.constant 0 : i32
    return %c0_i32, %c0_i32_0, %c0_i32_1 : i32, i32, i32
  }
  func.func @transform_19(%arg0: i32) -> (i32, i32, i32) {
    %c0_i32 = arith.constant 0 : i32
    %c0_i32_0 = arith.constant 0 : i32
    %c0_i32_1 = arith.constant 0 : i32
    %c0_i32_2 = arith.constant 0 : i32
    return %c0_i32, %c0_i32_0, %c0_i32_1 : i32, i32, i32
  }
  func.func @transform_20(%arg0: i32) -> (i32, i32) {
    %c0_i32 = arith.constant 0 : i32
    %c0_i32_0 = arith.constant 0 : i32
    %c0_i32_1 = arith.constant 0 : i32
    return %c0_i32, %c0_i32_0 : i32, i32
  }
  func.func @transform_21(%arg0: i32) -> (i32, i32) {
    %c0_i32 = arith.constant 0 : i32
    %c0_i32_0 = arith.constant 0 : i32
    %c0_i32_1 = arith.constant 0 : i32
    return %c0_i32, %c0_i32_0 : i32, i32
  }
  func.func @transform_22(%arg0: i32) -> (i32, i32) {
    %c0_i32 = arith.constant 0 : i32
    %c0_i32_0 = arith.constant 0 : i32
    %c0_i32_1 = arith.constant 0 : i32
    return %c0_i32, %c0_i32_0 : i32, i32
  }
  func.func @transform_23(%arg0: i32) -> (i32, i32) {
    %c0_i32 = arith.constant 0 : i32
    %c0_i32_0 = arith.constant 0 : i32
    %c0_i32_1 = arith.constant 0 : i32
    return %c0_i32, %c0_i32_0 : i32, i32
  }
  func.func @transform_24(%arg0: i32) -> (i32, i32) {
    %c0_i32 = arith.constant 0 : i32
    %c0_i32_0 = arith.constant 0 : i32
    %c0_i32_1 = arith.constant 0 : i32
    return %c0_i32, %c0_i32_0 : i32, i32
  }
  func.func @transform_25(%arg0: i32) -> (i32, i32) {
    %c0_i32 = arith.constant 0 : i32
    %c0_i32_0 = arith.constant 0 : i32
    %c0_i32_1 = arith.constant 0 : i32
    return %c0_i32, %c0_i32_0 : i32, i32
  }
}

</mosaic_0001>

<bundles_post_ra>
// kernel: deeper_intranode_agg_gnn.1
= control target key start
LH: loop header
LB: loop body
LE: loop exit
PB: predicated region body
PF: predicated region fallthrough
CT: control target
= control target key end

     0   :  { %vm187_vm0 = vcmask 1041408   ;;  %v2451_v0 = vmov 0.0   ;;  %vm2452_vm1 = vmmov 0   ;;  %vm253_vm2 = vcmask 1042432   ;;  %s3077_s5 = inlined_call_operand.vmem [shape: bf16[4,32], index: 5, kind: input, shape index: {}]   ;;  %s3078_s3 = inlined_call_operand.vmem [shape: f32[16,4], index: 3, kind: input, shape index: {}]   ;;  %s3079_s7 = inlined_call_operand.vmem [shape: bf16[6,32], index: 7, kind: input, shape index: {}]   ;;  %s3080_s4 = inlined_call_operand.vmem [shape: f32[32,6], index: 4, kind: input, shape index: {}]   ;;  %s3081_s9 = inlined_call_operand.vmem [shape: bf16[32,32], index: 9, kind: input, shape index: {}]   ;;  %s3082_s11 = inlined_call_operand.vmem [shape: bf16[32,32], index: 11, kind: input, shape index: {}]   ;;  %s3083_s8 = inlined_call_operand.vmem [shape: f32[1,32], index: 8, kind: input, shape index: {}]   ;;  %s3084_s6 = inlined_call_operand.vmem [shape: f32[1,32], index: 6, kind: input, shape index: {}]   ;;  %s3085_s10 = inlined_call_operand.vmem [shape: f32[1,32], index: 10, kind: input, shape index: {}]   ;;  %s3086_s12 = inlined_call_operand.vmem [shape: f32[1,32], index: 12, kind: input, shape index: {}]   ;;  %s3087_s0 = inlined_call_operand.vmem [shape: s32[32,1], index: 0, kind: input, shape index: {}]   ;;  %s3088_s15 = inlined_call_operand.vmem [shape: bf16[2,32,32], index: 15, kind: input, shape index: {}]   ;;  %s3089_s13 = inlined_call_operand.vmem [shape: f32[2,1,32], index: 13, kind: input, shape index: {}]   ;;  %s3090_s14 = inlined_call_operand.vmem [shape: f32[2,1,32], index: 14, kind: input, shape index: {}]   ;;  %s3091_s16 = inlined_call_operand.vmem [shape: bf16[2,32,32], index: 16, kind: input, shape index: {}]   ;;  %s3092_s2 = inlined_call_operand.vmem [shape: s32[1,32], index: 2, kind: input, shape index: {}]   ;;  %s3093_s17 = inlined_call_operand.vmem [shape: f32[2,1,32], index: 17, kind: input, shape index: {}]   ;;  %s3094_s18 = inlined_call_operand.vmem [shape: bf16[2,32,32], index: 18, kind: input, shape index: {}]   ;;  %s3095_s19 = inlined_call_operand.vmem [shape: f32[2,1,32], index: 19, kind: input, shape index: {}]   ;;  %s3096_s20 = inlined_call_operand.vmem [shape: bf16[32,1], index: 20, kind: input, shape index: {}]   ;;  %s3097_s21 = inlined_call_operand.vmem [shape: bf16[32,1], index: 21, kind: input, shape index: {}]   ;;  %s3098_s1 = inlined_call_operand.vmem [shape: s32[32,1], index: 1, kind: input, shape index: {}]   ;;  %s3099_s22 = inlined_call_operand.vmem [shape: bf16[32,1], index: 22, kind: input, shape index: {}]   ;;  %s3100_s23 = inlined_call_operand.<no memory space> [shape: f32[1,1], index: 23, kind: input, shape index: {}]   ;;  %s3101_s24 = inlined_call_operand.<no memory space> [shape: f32[1,1], index: 24, kind: input, shape index: {}]   ;;  %s3102_s25 = inlined_call_operand.vmem [shape: f32[32,2], index: 25, kind: output, shape index: {}]  }
   0x1   :  { %3107 = sst [smem:[#allocation4_spill]] %s3077_s5  ;;  %2183 = vmatprep.subr.bf16.mxu0 %v2451_v0  ;;  %2185 = vmatprep.mubr.msk.bf16.mxu0 %vm2452_vm1, %v2451_v0  ;;  %vm246_vm3 = vcmask 48128   ;;  %vm183_vm4 = vcmask 31744   ;;  %vm157_vm5 = vcmask 261120   ;;  %v2453_v61 = vmov 0  }
   0x2   :  { %3108 = sst [smem:[#allocation5_spill]] %s3078_s3  ;;  %2386 = vset.pattern.permute.xlu1 %v2453_v61  ;;  %2385 = vset.pattern.permute.xlu0 %v2453_v61  ;;  %v90_v61 = vld [vmem:[%s3087_s0 + $0x18] sm:$0xff]  ;;  %vm704_vm7 = vcmask 130048  }
   0x3   :  { %3109 = sst [smem:[#allocation6_spill]] %s3079_s7 }
   0x4   :  { %3110 = sst [smem:[#allocation7_spill]] %s3080_s4  ;;  %s3118_s4 = sld [smem:[#allocation5_spill]] }
   0x5   :  { %3111 = sst [smem:[#allocation8_spill]] %s3081_s9  ;;  %s3119_s9 = sld [smem:[#allocation6_spill]] }
   0x6   :  { %3112 = sst [smem:[#allocation9_spill]] %s3082_s11  ;;  %s3120_s11 = sld [smem:[#allocation7_spill]] }
   0x7   :  { %3113 = sst [smem:[#allocation10_spill]] %s3083_s8  ;;  %s3117_s8 = sld [smem:[#allocation4_spill]] }
   0x8   :  { %3114 = sst [smem:[#allocation11_spill]] %s3084_s6  ;;  %s3121_s3 = sld [smem:[#allocation8_spill]] }
   0x9   :  { %3115 = sst [smem:[#allocation12_spill]] %s3085_s10 }
   0xa   :  { %3116 = sst [smem:[#allocation13_spill]] %s3086_s12  ;;  %v172_v2 = vld [vmem:[%s3118_s4] sm:$0xff]  ;;  %v173_v3 = vld [vmem:[%s3118_s4 + $0x8] sm:$0xff]  ;;  %s3122_s12 = sld [smem:[#allocation9_spill]] }
   0xb   :  { %v175_v5 = vpack.c.bf16 %v173_v3, %v172_v2  ;;  %v236_v6 = vld [vmem:[%s3119_s9] sm:$0x7]  ;;  %s3124_s4 = sld [smem:[#allocation11_spill]]  ;;  %s3125_s10 = sld [smem:[#allocation12_spill]] }
   0xc   :  { %v232_v7 = vld [vmem:[%s3120_s11] sm:$0xff]  ;;  %v233_v8 = vld [vmem:[%s3120_s11 + $0x8] sm:$0xff]  ;;  %2381 = vmatprep.subr.msk.bf16.mxu1 %vm253_vm2, %v236_v6  ;;  %v255_v9 = vsel %vm253_vm2, %v236_v6, 0  ;;  %v234_v11 = vld [vmem:[%s3120_s11 + $0x10] sm:$0xff]  ;;  %s3126_s28 = sld [smem:[#allocation13_spill]]  ;;  %vm1995_vm2 = vcmask 15360  }
   0xd   :  { %v174_v1 = vld [vmem:[%s3117_s8] sm:$0x3]  ;;  %v237_v10 = vpack.c.bf16 %v233_v8, %v232_v7  ;;  %v235_v12 = vld [vmem:[%s3120_s11 + $0x18] sm:$0xff]  ;;  %2190 = vmatpush3.bf16.msra.mxu1 %v255_v9  ;;  %s3123_s8 = sld [smem:[#allocation10_spill]] }
   0xe   :  { %v189_v4 = vsel %vm187_vm0, %v174_v1, 0  ;;  %v238_v13 = vpack.c.bf16 %v235_v12, %v234_v11  ;;  %v2387_v14 = vld [vmem:[%s3121_s3] sm:$0xff]   ;;  %v2388_v15 = vld [vmem:[%s3121_s3 + $0x8] sm:$0xff]  }
   0xf   :  { %2184 = vmatpush3.bf16.msra.mxu0 %v189_v4  ;;  %2191 = vmatprep.mubr.msk.bf16.mxu1 %vm246_vm3, %v237_v10 }
  0x10   :  { %2195 = vmatprep.subr.bf16.mxu0 %v2451_v0  ;;  %2192 = vmatmul.mubr.msk.bf16.vlgmr.msra.gmra.mrb[0].mxu1 %vm246_vm3, %v238_v13  ;;  %v2389_v16 = vld [vmem:[%s3122_s12] sm:$0xff]   ;;  %v2390_v17 = vld [vmem:[%s3122_s12 + $0x8] sm:$0xff]  }
  0x11   :  { %2203 = vmatprep.subr.bf16.mxu1 %v2389_v16  ;;  %v2015_v19 = vld [vmem:[%s3124_s4] ss:$0 sm:$0xff] }
  0x12   :  { %2186 = vmatmul.mubr.msk.bf16.vlgmr.msra.gmra.mrb[0].mxu0 %vm183_vm4, %v175_v5  ;;  %2204 = vmatpush3.bf16.msra.mxu1 %v2389_v16  ;;  %v2020_v37 = vld [vmem:[%s3125_s10] ss:$0 sm:$0xff] }
  0x13   :  { %2199 = vmatprep.mubr.msk.bf16.mxu0 %vm2452_vm1, %v2451_v0  ;;  %2196 = vmatpush3.bf16.msra.mxu0 %v2387_v14  ;;  %v2017_v18 = vld [vmem:[%s3123_s8] ss:$0 sm:$0xff] }
  0x14   :  { %2197 = vmatprep.subr.bf16.mxu0 %v2451_v0  ;;  %2205 = vmatprep.subr.bf16.mxu1 %v2390_v17  ;;  %v2024_v42 = vld [vmem:[%s3126_s28] ss:$0 sm:$0xff] }
  0x16   :  { %2206 = vmatpush3.bf16.msra.mxu1 %v2390_v17 }
  0x17   :  { %2198 = vmatpush3.bf16.msra.mxu0 %v2388_v15 }
  0x18   :  { %2211 = vmatprep.subr.bf16.mxu0 %v2451_v0 }
  0xe3   :  { %v2193_v22 = vpop.f32.mrb[0].mxu1 }
  0xe4   :  { %v300_v24 = vadd.f32 %v2193_v22, %v2017_v18  ;;  %v291_v25 = vpop.f32.mrb[1].mxu1 }
  0xe5   :  { %v225_v20 = vpop.f32.mrb[0].mxu0  ;;  %v292_v29 = vadd.f32 %v2017_v18, %v291_v25  ;;  %v2194_v30 = vpop.f32.mrb[2].mxu1  ;;  %v2392_v25 = vld [vmem:[%s3088_s15 + $0x8] sm:$0xff]  }
  0xe6   :  { %v2187_v21 = vpop.f32.mrb[1].mxu0  ;;  %v226_v26 = vadd.f32 %v2015_v19, %v225_v20  ;;  %v303_v31 = vadd.f32 %v2194_v30, %v2017_v18  ;;  %v294_v32 = vpop.f32.mrb[3].mxu1 }
  0xe7   :  { %v228_v23 = vpop.f32.mrb[2].mxu0  ;;  %v295_v34 = vadd.f32 %v2017_v18, %v294_v32 }
  0xe8   :  { %v229_v27 = vadd.f32 %v2015_v19, %v228_v23  ;;  %v2188_v28 = vpop.f32.mrb[3].mxu0  ;;  %v381_v35 = vpack.c.bf16 %v303_v31, %v300_v24  ;;  %v88_v23 = vld [vmem:[%s3087_s0 + $0x8] sm:$0xff]  ;;  %v2391_v24 = vld [vmem:[%s3088_s15] sm:$0xff]  }
  0xe9   :  { %v380_v36 = vpack.c.bf16 %v295_v34, %v292_v29 }
  0xea   :  { %v310_v33 = vpack.c.bf16 %v229_v27, %v226_v26  ;;  %v87_v26 = vld [vmem:[%s3087_s0] sm:$0xff] }
  0xeb   :  { %2207 = vmatprep.mubr.msk.bf16.mxu1 %vm157_vm5, %v380_v36 }
  0xec   :  { %2200 = vmatmul.mubr.msk.bf16.vlgmr.msra.gmra.mrb[4].mxu0 %vm157_vm5, %v310_v33  ;;  %2208 = vmatmul.mubr.msk.bf16.vlgmr.msra.gmra.mrb[4].mxu1 %vm157_vm5, %v381_v35 }
  0xed   :  { %2215 = vmatprep.mubr.msk.bf16.mxu0 %vm2452_vm1, %v2451_v0  ;;  %2212 = vmatpush3.bf16.msra.mxu0 %v2391_v24 }
  0xee   :  { %2213 = vmatprep.subr.bf16.mxu0 %v2451_v0 }
  0xf1   :  { %2214 = vmatpush3.bf16.msra.mxu0 %v2392_v25 }
 0x1bf   :  { %v367_v38 = vpop.f32.mrb[4].mxu0  ;;  %v2209_v46 = vpop.f32.mrb[4].mxu1 }
 0x1c0   :  { %v368_v39 = vadd.f32 %v2020_v37, %v367_v38  ;;  %v2201_v40 = vpop.f32.mrb[5].mxu0  ;;  %v441_v47 = vpop.f32.mrb[5].mxu1  ;;  %v450_v51 = vadd.f32 %v2209_v46, %v2024_v42  ;;  %v2701_v38 = vld [vmem:[%s3089_s13] ss:$0 sm:$0xff] }
 0x1c1   :  { %v370_v41 = vpop.f32.mrb[6].mxu0  ;;  %v442_v50 = vadd.f32 %v2024_v42, %v441_v47  ;;  %v2210_v57 = vpop.f32.mrb[6].mxu1 }
 0x1c2   :  { %v2645_v43 = vmax.f32 %v368_v39, 0.0  ;;  %v371_v44 = vadd.f32 %v2020_v37, %v370_v41  ;;  %v2202_v45 = vpop.f32.mrb[7].mxu0  ;;  %v2655_v54 = vmax.f32 %v450_v51, 0.0  ;;  %v444_v58 = vpop.f32.mrb[7].mxu1  ;;  %v453_v59 = vadd.f32 %v2210_v57, %v2024_v42 }
 0x1c3   :  { %v2651_v52 = vmax.f32 %v442_v50, 0.0  ;;  %v445_v60 = vadd.f32 %v2024_v42, %v444_v58 }
 0x1c4   :  { %v2647_v48 = vmax.f32 %v371_v44, 0.0  ;;  %v462_v49 = vsel %vm157_vm5, %v2645_v43, 0.0  ;;  %v512_v56 = vsel %vm157_vm5, %v2655_v54, 0.0  ;;  %v2670_v14 = vmax.f32 %v453_v59, 0.0 }
 0x1c5   :  { %463 = vadd.xlane.f32.xlu0 %v462_v49  ;;  %v506_v55 = vsel %vm157_vm5, %v2651_v52, 0.0  ;;  %v2664_v9 = vmax.f32 %v445_v60, 0.0  ;;  %v2718_v49 = vld [vmem:[%s3090_s14] ss:$0 sm:$0xff]  ;;  %v89_v60 = vld [vmem:[%s3087_s0 + $0x10] sm:$0xff] }
 0x1c6   :  { %v465_v53 = vsel %vm157_vm5, %v2647_v48, 0.0  ;;  %v515_v20 = vsel %vm157_vm5, %v2670_v14, 0.0 }
 0x1c7   :  { %v509_v16 = vsel %vm157_vm5, %v2664_v9, 0.0 }
 0x1c9   :  { %466 = vadd.xlane.f32.xlu0 %v465_v53 }
 0x1cd   :  { %507 = vadd.xlane.f32.xlu0 %v506_v55 }
 0x1d1   :  { %513 = vadd.xlane.f32.xlu0 %v512_v56 }
 0x252   :  { %v464_v62 = vpop.xlane.xlu0 %463 }
 0x253   :  { %v468_v63 = vmul.f32 0.03125, %v464_v62  ;;  %v2393_v62 = vld [vmem:[%s3091_s16] sm:$0xff]  }
 0x254   :  { %2219 = vmatprep.subr.bf16.mxu1 %v2393_v62 }
 0x255   :  { %v470_v1 = vsub.f32 %v2645_v43, %v468_v63  ;;  %v2394_v63 = vld [vmem:[%s3091_s16 + $0x8] sm:$0xff]   ;;  %2220 = vmatpush3.bf16.msra.mxu1 %v2393_v62 }
 0x256   :  { %v467_v2 = vpop.xlane.xlu0 %466  ;;  %2221 = vmatprep.subr.bf16.mxu1 %v2394_v63 }
 0x257   :  { %v469_v3 = vmul.f32 0.03125, %v467_v2  ;;  %v472_v4 = vmul.f32 %v470_v1, %v470_v1  ;;  %v85_v2 = vlaneseq }
 0x259   :  { %v471_v5 = vsub.f32 %v2647_v48, %v469_v3  ;;  %v474_v6 = vsel %vm157_vm5, %v472_v4, 0.0  ;;  %2222 = vmatpush3.bf16.msra.mxu1 %v2394_v63  ;;  %v2737_v4 = vand.u32 127, %v85_v2 }
 0x25a   :  { %475 = vadd.xlane.f32.xlu1 %v474_v6  ;;  %v508_v7 = vpop.xlane.xlu0 %507 }
 0x25b   :  { %v518_v8 = vmul.f32 0.03125, %v508_v7  ;;  %v473_v10 = vmul.f32 %v471_v5, %v471_v5  ;;  %v144_v7 = vshrl.u32 %v85_v2, 7 }
 0x25d   :  { %v2667_v11 = vsub.f32 %v2651_v52, %v518_v8  ;;  %v477_v12 = vsel %vm157_vm5, %v473_v10, 0.0  ;;  %v2012_v8 = vld [vmem:[%s3092_s2] ss:$0 sm:$0xff]  ;;  %v145_v10 = vadd.s32 8, %v144_v7 }
 0x25e   :  { %478 = vadd.xlane.f32.xlu1 %v477_v12  ;;  %v514_v13 = vpop.xlane.xlu0 %513  ;;  %vm151_vm8 = vcmp.eq.s32.totalorder %v2012_v8, %v144_v7 }
 0x25f   :  { %v520_v15 = vmul.f32 0.03125, %v514_v13  ;;  %v526_v17 = vmul.f32 %v2667_v11, %v2667_v11  ;;  %v2749_v12 = vsel %vm151_vm8, 1.0, %v2451_v0  ;;  %vm152_vm9 = vcmp.eq.s32.totalorder %v2012_v8, %v145_v10 }
 0x260   :  { %v158_v13 = vsel %vm157_vm5, %v2749_v12, 0.0 }
 0x261   :  { %v2677_v18 = vsub.f32 %v2655_v54, %v520_v15  ;;  %v530_v19 = vsel %vm157_vm5, %v526_v17, 0.0  ;;  %v2754_v15 = vsel %vm152_vm9, 1.0, %v2451_v0 }
 0x262   :  { %510 = vadd.xlane.f32.xlu1 %v509_v16  ;;  %531 = vadd.xlane.f32.xlu0 %v530_v19  ;;  %v161_v16 = vsel %vm157_vm5, %v2754_v15, 0.0 }
 0x263   :  { %v528_v21 = vmul.f32 %v2677_v18, %v2677_v18 }
 0x265   :  { %v536_v22 = vsel %vm157_vm5, %v528_v21, 0.0 }
 0x266   :  { %516 = vadd.xlane.f32.xlu1 %v515_v20  ;;  %537 = vadd.xlane.f32.xlu0 %v536_v22 }
 0x277   :  { %95 = vperm.xlu1 %2386, %v88_v23  }
 0x27c   :  { %92 = vperm.xlu0 %2385, %v87_v26  }
 0x29b   :  { %162 = vadd.xlane.f32.xlu0 %v161_v16 }
 0x2e7   :  { %v476_v27 = vpop.xlane.xlu1 %475 }
 0x2e8   :  { %v480_v28 = vmul.f32 0.03125, %v476_v27 }
 0x2ea   :  { %v482_v29 = vadd.f32 1e-05, %v480_v28 }
 0x2eb   :  { %v479_v30 = vpop.xlane.xlu1 %478 }
 0x2ec   :  { %2409 = vrsqrt.f32 %v482_v29  ;;  %v481_v31 = vmul.f32 0.03125, %v479_v30 }
 0x2ee   :  { %v483_v32 = vadd.f32 1e-05, %v481_v31 }
 0x2ef   :  { %v511_v33 = vpop.xlane.xlu1 %510 }
 0x2f0   :  { %2411 = vrsqrt.f32 %v483_v32  ;;  %v519_v34 = vmul.f32 0.03125, %v511_v33 }
 0x2f2   :  { %v2704_v39 = vsub.f32 %v2664_v9, %v519_v34 }
 0x2f3   :  { %v517_v35 = vpop.xlane.xlu1 %516 }
 0x2f4   :  { %v521_v36 = vmul.f32 0.03125, %v517_v35  ;;  %v527_v47 = vmul.f32 %v2704_v39, %v2704_v39 }
 0x2f6   :  { %v2410_v37 = vpop.eup %2409  ;;  %v2707_v40 = vsub.f32 %v2670_v14, %v521_v36  ;;  %v533_v55 = vsel %vm157_vm5, %v527_v47, 0.0 }
 0x2f7   :  { %v486_v41 = vmul.f32 %v2410_v37, %v470_v1  ;;  %v532_v1 = vpop.xlane.xlu0 %531  ;;  %v96_v20 = vpop.permute.xlu1 %95 }
 0x2f8   :  { %v529_v42 = vmul.f32 %v2707_v40, %v2707_v40  ;;  %v542_v17 = vmul.f32 0.03125, %v532_v1  ;;  %vm104_vm10 = vcmp.eq.s32.totalorder %v96_v20, %v2737_v4 }
 0x2f9   :  { %v494_v44 = vmul.f32 %v2701_v38, %v486_v41  ;;  %v2776_v62 = vsel %vm104_vm10, 1.0, %v2451_v0 }
 0x2fa   :  { %v2412_v45 = vpop.eup %2411  ;;  %v539_v46 = vsel %vm157_vm5, %v529_v42, 0.0  ;;  %v546_v21 = vadd.f32 1e-05, %v542_v17 }
 0x2fb   :  { %v487_v50 = vmul.f32 %v2412_v45, %v471_v5  ;;  %540 = vadd.xlane.f32.xlu1 %v539_v46  ;;  %v502_v53 = vadd.f32 %v2718_v49, %v494_v44  ;;  %v538_v3 = vpop.xlane.xlu0 %537 }
 0x2fc   :  { %v544_v19 = vmul.f32 0.03125, %v538_v3  ;;  %2413 = vrsqrt.f32 %v546_v21  ;;  %v2042_v21 = vld [vmem:[%s3093_s17] ss:$0 sm:$0xff] }
 0x2fd   :  { %v495_v51 = vmul.f32 %v2701_v38, %v487_v50  ;;  %v504_v57 = vmax.f32 %v502_v53, 0.0 }
 0x2fe   :  { %v548_v22 = vadd.f32 1e-05, %v544_v19 }
 0x2ff   :  { %534 = vadd.xlane.f32.xlu1 %v533_v55  ;;  %v503_v56 = vadd.f32 %v2718_v49, %v495_v51  ;;  %v93_v5 = vpop.permute.xlu0 %92 }
 0x300   :  { %vm103_vm6 = vcmp.eq.s32.totalorder %v93_v5, %v2737_v4  ;;  %2415 = vrsqrt.f32 %v548_v22 }
 0x301   :  { %v505_v58 = vmax.f32 %v503_v56, 0.0  ;;  %v2741_v6 = vsel %vm103_vm6, 1.0, %v2451_v0 }
 0x303   :  { %v574_v59 = vpack.c.bf16 %v505_v58, %v504_v57 }
 0x305   :  { %2216 = vmatmul.mubr.msk.bf16.vlgmr.msra.gmra.mrb[8].mxu0 %vm157_vm5, %v574_v59 }
 0x306   :  { %2231 = vmatprep.mubr.msk.f32.mxu0 %vm704_vm7, %v2741_v6  ;;  %v2414_v29 = vpop.eup %2413 }
 0x307   :  { %v554_v31 = vmul.f32 %v2414_v29, %v2667_v11 }
 0x309   :  { %v558_v36 = vmul.f32 %v2701_v38, %v554_v31 }
 0x30a   :  { %v2416_v30 = vpop.eup %2415 }
 0x30b   :  { %v556_v33 = vmul.f32 %v2416_v30, %v2677_v18  ;;  %v562_v11 = vadd.f32 %v2718_v49, %v558_v36 }
 0x30d   :  { %v560_v41 = vmul.f32 %v2701_v38, %v556_v33  ;;  %v566_v47 = vmax.f32 %v562_v11, 0.0 }
 0x30f   :  { %v564_v46 = vadd.f32 %v2718_v49, %v560_v41 }
 0x310   :  { %98 = vperm.xlu1 %2386, %v89_v60  }
 0x311   :  { %v568_v51 = vmax.f32 %v564_v46, 0.0 }
 0x314   :  { %101 = vperm.xlu1 %2386, %v90_v61  }
 0x328   :  { %v163_v17 = vpop.xlane.xlu0 %162 }
 0x329   :  { %v165_v19 = vmax.f32 %v163_v17, 1.0 }
 0x338   :  { %159 = vadd.xlane.f32.xlu1 %v158_v13 }
 0x388   :  { %v541_v23 = vpop.xlane.xlu1 %540 }
 0x389   :  { %v545_v24 = vmul.f32 0.03125, %v541_v23 }
 0x38b   :  { %v549_v25 = vadd.f32 1e-05, %v545_v24 }
 0x38c   :  { %v535_v26 = vpop.xlane.xlu1 %534 }
 0x38d   :  { %2417 = vrsqrt.f32 %v549_v25  ;;  %v543_v27 = vmul.f32 0.03125, %v535_v26 }
 0x38f   :  { %v547_v28 = vadd.f32 1e-05, %v543_v27 }
 0x391   :  { %2419 = vrsqrt.f32 %v547_v28 }
 0x397   :  { %v2418_v32 = vpop.eup %2417 }
 0x398   :  { %v557_v34 = vmul.f32 %v2418_v32, %v2707_v40 }
 0x39a   :  { %v561_v35 = vmul.f32 %v2701_v38, %v557_v34 }
 0x39b   :  { %v2420_v37 = vpop.eup %2419 }
 0x39c   :  { %v555_v42 = vmul.f32 %v2420_v37, %v2704_v39  ;;  %v565_v44 = vadd.f32 %v2718_v49, %v561_v35  ;;  %v99_v39 = vpop.permute.xlu1 %98 }
 0x39d   :  { %vm105_vm11 = vcmp.eq.s32.totalorder %v99_v39, %v2737_v4 }
 0x39e   :  { %v559_v45 = vmul.f32 %v2701_v38, %v555_v42  ;;  %v569_v40 = vmax.f32 %v565_v44, 0.0  ;;  %v2779_v63 = vsel %vm105_vm11, 1.0, %v2451_v0 }
 0x3a0   :  { %v563_v18 = vadd.f32 %v2718_v49, %v559_v45  ;;  %v636_v55 = vpack.c.bf16 %v569_v40, %v568_v51  ;;  %v102_v61 = vpop.permute.xlu1 %101 }
 0x3a1   :  { %vm106_vm12 = vcmp.eq.s32.totalorder %v102_v61, %v2737_v4 }
 0x3a2   :  { %v567_v50 = vmax.f32 %v563_v18, 0.0  ;;  %v2787_v1 = vsel %vm106_vm12, 1.0, %v2451_v0 }
 0x3a4   :  { %v635_v53 = vpack.c.bf16 %v567_v50, %v566_v47 }
 0x3a6   :  { %2223 = vmatprep.mubr.msk.bf16.mxu1 %vm157_vm5, %v635_v53 }
 0x3a7   :  { %2224 = vmatmul.mubr.msk.bf16.vlgmr.msra.gmra.mrb[8].mxu1 %vm157_vm5, %v636_v55 }
 0x3c5   :  { %v160_v2 = vpop.xlane.xlu1 %159 }
 0x3c6   :  { %v164_v3 = vmax.f32 %v160_v2, 1.0 }
 0x3c8   :  { %2421 = vrcp.f32 %v164_v3 }
 0x3c9   :  { %2423 = vrcp.f32 %v165_v19 }
 0x3d2   :  { %v2422_v5 = vpop.eup %2421 }
 0x3d3   :  { %v2794_v7 = vmul.f32 %v2422_v5, %v2749_v12  ;;  %v2424_v42 = vpop.eup %2423 }
 0x3d4   :  { %v2822_v11 = vmul.f32 %v2424_v42, %v2754_v15  ;;  %v2396_v15 = vld [vmem:[%s3094_s18 + $0x8] sm:$0xff]  }
 0x3d5   :  { %2245 = vmatprep.mubr.msk.f32.mxu1 %vm157_vm5, %v2794_v7 }
 0x3d8   :  { %v624_v56 = vpop.f32.mrb[8].mxu0 }
 0x3d9   :  { %v2217_v57 = vpop.f32.mrb[9].mxu0 }
 0x3da   :  { %v627_v58 = vpop.f32.mrb[10].mxu0 }
 0x3db   :  { %v2345_v59 = vpack.c.bf16 %v627_v58, %v624_v56  ;;  %v2218_v60 = vpop.f32.mrb[11].mxu0 }
 0x3dc   :  { %v2045_v60 = vld [vmem:[%s3095_s19] ss:$0 sm:$0xff] }
 0x3dd   :  { %2346 = vmatprep.subr.bf16.mxu0 %v2345_v59 }
 0x3de   :  { %2348 = vmatpush3.bf16.msra.mxu0 %v2345_v59 }
 0x3df   :  { %2248 = vmatprep.subr.bf16.mxu0 %v2451_v0 }
 0x3e1   :  { %2232 = vmatmul.mubr.msk.f32.vlgmr.msra.gmra.mrb[12].mxu0 %vm704_vm7, %v2776_v62 }
 0x3e2   :  { %2234 = vmatprep.mubr.msk.f32.mxu0 %vm704_vm7, %v2779_v63 }
 0x3e5   :  { %2235 = vmatmul.mubr.msk.f32.gmra.mrb[14].mxu0 %vm704_vm7, %v2787_v1 }
 0x3e6   :  { %2252 = vmatprep.mubr.msk.bf16.mxu0 %vm2452_vm1, %v2451_v0 }
 0x47a   :  { %v2225_v8 = vpop.f32.mrb[8].mxu1 }
 0x47b   :  { %v689_v10 = vpop.f32.mrb[9].mxu1 }
 0x47c   :  { %v2226_v13 = vpop.f32.mrb[10].mxu1 }
 0x47d   :  { %v692_v16 = vpop.f32.mrb[11].mxu1 }
 0x4b4   :  { %v2233_v20 = vpop.f32.mrb[12].mxu0 }
 0x4b5   :  { %v789_v22 = vadd.f32 %v2233_v20, %v692_v16  ;;  %v783_v23 = vpop.f32.mrb[13].mxu0 }
 0x4b6   :  { %v784_v24 = vadd.f32 %v783_v23, %v689_v10 }
 0x4b7   :  { %v2801_v12 = vadd.f32 %v2042_v21, %v789_v22 }
 0x4b8   :  { %v809_v25 = vadd.f32 %v2042_v21, %v784_v24  ;;  %v2236_v26 = vpop.f32.mrb[14].mxu0 }
 0x4b9   :  { %v814_v27 = vmax.f32 %v2801_v12, 0.0  ;;  %v799_v28 = vadd.f32 %v2236_v26, %v2226_v13  ;;  %v793_v29 = vpop.f32.mrb[15].mxu0  ;;  %v2397_v12 = vld [vmem:[%s3088_s15 + $0x10] sm:$0xff]  }
 0x4ba   :  { %v813_v30 = vmax.f32 %v809_v25, 0.0  ;;  %v794_v31 = vadd.f32 %v2225_v8, %v793_v29 }
 0x4bb   :  { %v2804_v32 = vadd.f32 %v2042_v21, %v799_v28  ;;  %v2869_v29 = vadd.f32 %v814_v27, %v2664_v9  ;;  %v2398_v9 = vld [vmem:[%s3088_s15 + $0x18] sm:$0xff]  }
 0x4bc   :  { %v811_v33 = vadd.f32 %v2042_v21, %v794_v31  ;;  %v2349_v34 = vpack.c.bf16 %v814_v27, %v813_v30  ;;  %v2809_v35 = vadd.f32 %v813_v30, %v2651_v52 }
 0x4bd   :  { %v816_v36 = vmax.f32 %v2804_v32, 0.0  ;;  %v1023_v30 = vsel %vm157_vm5, %v2869_v29, 0.0 }
 0x4be   :  { %v815_v37 = vmax.f32 %v811_v33, 0.0  ;;  %2350 = vmatprep.subr.bf16.mxu1 %v2349_v34  ;;  %v1020_v41 = vsel %vm157_vm5, %v2809_v35, 0.0 }
 0x4bf   :  { %1021 = vadd.xlane.f32.xlu0 %v1020_v41  ;;  %2352 = vmatpush3.bf16.msra.mxu1 %v2349_v34  ;;  %v2876_v31 = vadd.f32 %v816_v36, %v2670_v14 }
 0x4c0   :  { %v2353_v44 = vpack.c.bf16 %v816_v36, %v815_v37  ;;  %v2817_v45 = vadd.f32 %v815_v37, %v2655_v54  ;;  %v2395_v54 = vld [vmem:[%s3094_s18] sm:$0xff]  }
 0x4c1   :  { %2249 = vmatpush3.bf16.msra.mxu0 %v2395_v54  ;;  %v1029_v33 = vsel %vm157_vm5, %v2876_v31, 0.0 }
 0x4c2   :  { %2354 = vmatprep.subr.bf16.mxu1 %v2353_v44  ;;  %v1026_v52 = vsel %vm157_vm5, %v2817_v45, 0.0  ;;  %2250 = vmatprep.subr.bf16.mxu0 %v2451_v0 }
 0x4c3   :  { %1027 = vadd.xlane.f32.xlu0 %v1026_v52  ;;  %2356 = vmatpush3.bf16.msra.mxu1 %v2353_v44 }
 0x4c4   :  { %2256 = vmatprep.subr.bf16.mxu1 %v2451_v0 }
 0x4c5   :  { %2251 = vmatpush3.bf16.msra.mxu0 %v2396_v15 }
 0x4c6   :  { %2246 = vmatmul.mubr.msk.f32.vlgmr.msra.gmra.mrb[12].mxu1 %vm157_vm5, %v2822_v11 }
 0x4c7   :  { %2260 = vmatprep.mubr.msk.bf16.mxu1 %vm2452_vm1, %v2451_v0  ;;  %2257 = vmatpush3.bf16.msra.mxu1 %v2397_v12 }
 0x4c8   :  { %2258 = vmatprep.subr.bf16.mxu1 %v2451_v0 }
 0x4cb   :  { %2259 = vmatpush3.bf16.msra.mxu1 %v2398_v9 }
 0x54c   :  { %v1022_v46 = vpop.xlane.xlu0 %1021 }
 0x54d   :  { %v1032_v18 = vmul.f32 0.03125, %v1022_v46 }
 0x54f   :  { %v2837_v40 = vsub.f32 %v2809_v35, %v1032_v18 }
 0x550   :  { %v1028_v47 = vpop.xlane.xlu0 %1027 }
 0x551   :  { %v1034_v50 = vmul.f32 0.03125, %v1028_v47  ;;  %v1040_v51 = vmul.f32 %v2837_v40, %v2837_v40 }
 0x553   :  { %v2842_v53 = vsub.f32 %v2817_v45, %v1034_v50  ;;  %v1044_v55 = vsel %vm157_vm5, %v1040_v51, 0.0  ;;  %v2051_v51 = vld [vmem:[%s3089_s13 + $0x1] ss:$0 sm:$0xff] }
 0x554   :  { %1045 = vadd.xlane.f32.xlu0 %v1044_v55 }
 0x555   :  { %v1042_v39 = vmul.f32 %v2842_v53, %v2842_v53 }
 0x557   :  { %v1050_v56 = vsel %vm157_vm5, %v1042_v39, 0.0 }
 0x558   :  { %1051 = vadd.xlane.f32.xlu0 %v1050_v56 }
 0x599   :  { %v2247_v57 = vpop.f32.mrb[12].mxu1 }
 0x59a   :  { %v889_v58 = vpop.f32.mrb[13].mxu1 }
 0x59b   :  { %v902_v59 = vpack.c.bf16 %v2247_v57, %v889_v58 }
 0x59d   :  { %2253 = vmatmul.mubr.msk.bf16.vlgmr.msra.gmra.mrb[16].mxu0 %vm157_vm5, %v902_v59  ;;  %v2052_v59 = vld [vmem:[%s3090_s14 + $0x1] ss:$0 sm:$0xff] }
 0x670   :  { %v959_v61 = vpop.f32.mrb[16].mxu0 }
 0x671   :  { %v960_v2 = vadd.f32 %v2045_v60, %v959_v61  ;;  %v2254_v3 = vpop.f32.mrb[17].mxu0 }
 0x672   :  { %v962_v5 = vpop.f32.mrb[18].mxu0 }
 0x673   :  { %v2853_v8 = vadd.f32 %v960_v2, %v2645_v43  ;;  %v963_v10 = vadd.f32 %v2045_v60, %v962_v5  ;;  %v2255_v13 = vpop.f32.mrb[19].mxu0 }
 0x674   :  { %v2399_v13 = vld [vmem:[%s3091_s16 + $0x10] sm:$0xff]  }
 0x675   :  { %v2856_v16 = vadd.f32 %v963_v10, %v2647_v48  ;;  %v976_v17 = vsel %vm157_vm5, %v2853_v8, 0.0  ;;  %2264 = vmatprep.subr.bf16.mxu0 %v2399_v13 }
 0x676   :  { %977 = vadd.xlane.f32.xlu1 %v976_v17  ;;  %v2400_v17 = vld [vmem:[%s3091_s16 + $0x18] sm:$0xff]   ;;  %2265 = vmatpush3.bf16.msra.mxu0 %v2399_v13 }
 0x677   :  { %v979_v19 = vsel %vm157_vm5, %v2856_v16, 0.0  ;;  %2266 = vmatprep.subr.bf16.mxu0 %v2400_v17 }
 0x67a   :  { %980 = vadd.xlane.f32.xlu1 %v979_v19  ;;  %2267 = vmatpush3.bf16.msra.mxu0 %v2400_v17  ;;  %v1046_v19 = vpop.xlane.xlu0 %1045 }
 0x703   :  { %v978_v20 = vpop.xlane.xlu1 %977 }
 0x704   :  { %v982_v21 = vmul.f32 0.03125, %v978_v20  ;;  %v1056_v20 = vmul.f32 0.03125, %v1046_v19 }
 0x706   :  { %v984_v22 = vsub.f32 %v2853_v8, %v982_v21  ;;  %v1052_v21 = vpop.xlane.xlu0 %1051 }
 0x707   :  { %v981_v23 = vpop.xlane.xlu1 %980 }
 0x708   :  { %v983_v43 = vmul.f32 0.03125, %v981_v23  ;;  %v986_v24 = vmul.f32 %v984_v22, %v984_v22  ;;  %v1058_v23 = vmul.f32 0.03125, %v1052_v21 }
 0x70a   :  { %v985_v25 = vsub.f32 %v2856_v16, %v983_v43  ;;  %v988_v48 = vsel %vm157_vm5, %v986_v24, 0.0  ;;  %v1062_v43 = vadd.f32 1e-05, %v1058_v23 }
 0x70b   :  { %989 = vadd.xlane.f32.xlu1 %v988_v48 }
 0x70c   :  { %v987_v26 = vmul.f32 %v985_v25, %v985_v25 }
 0x70e   :  { %v991_v28 = vsel %vm157_vm5, %v987_v26, 0.0 }
 0x70f   :  { %992 = vadd.xlane.f32.xlu1 %v991_v28 }
 0x713   :  { %1024 = vadd.xlane.f32.xlu1 %v1023_v30 }
 0x717   :  { %1030 = vadd.xlane.f32.xlu1 %v1029_v33 }
 0x798   :  { %v990_v27 = vpop.xlane.xlu1 %989 }
 0x799   :  { %v994_v14 = vmul.f32 0.03125, %v990_v27 }
 0x79b   :  { %v996_v32 = vadd.f32 1e-05, %v994_v14 }
 0x79c   :  { %v993_v34 = vpop.xlane.xlu1 %992 }
 0x79d   :  { %2425 = vrsqrt.f32 %v996_v32  ;;  %v995_v36 = vmul.f32 0.03125, %v993_v34 }
 0x79f   :  { %v997_v37 = vadd.f32 1e-05, %v995_v36 }
 0x7a0   :  { %v1025_v41 = vpop.xlane.xlu1 %1024 }
 0x7a1   :  { %2427 = vrsqrt.f32 %v997_v37  ;;  %v1033_v42 = vmul.f32 0.03125, %v1025_v41 }
 0x7a3   :  { %v1037_v44 = vsub.f32 %v2869_v29, %v1033_v42 }
 0x7a4   :  { %v1031_v52 = vpop.xlane.xlu1 %1030 }
 0x7a5   :  { %v1035_v54 = vmul.f32 0.03125, %v1031_v52  ;;  %v1041_v15 = vmul.f32 %v1037_v44, %v1037_v44 }
 0x7a7   :  { %v2426_v46 = vpop.eup %2425  ;;  %v1039_v18 = vsub.f32 %v2876_v31, %v1035_v54  ;;  %v1047_v47 = vsel %vm157_vm5, %v1041_v15, 0.0 }
 0x7a8   :  { %v1000_v50 = vmul.f32 %v2426_v46, %v984_v22  ;;  %1048 = vadd.xlane.f32.xlu1 %v1047_v47  ;;  %v1060_v22 = vadd.f32 1e-05, %v1056_v20 }
 0x7a9   :  { %v1043_v55 = vmul.f32 %v1039_v18, %v1039_v18 }
 0x7aa   :  { %v1008_v39 = vmul.f32 %v2051_v51, %v1000_v50  ;;  %2429 = vrsqrt.f32 %v1060_v22 }
 0x7ab   :  { %v2428_v56 = vpop.eup %2427  ;;  %v1053_v57 = vsel %vm157_vm5, %v1043_v55, 0.0  ;;  %2431 = vrsqrt.f32 %v1062_v43 }
 0x7ac   :  { %v1001_v58 = vmul.f32 %v2428_v56, %v985_v25  ;;  %1054 = vadd.xlane.f32.xlu1 %v1053_v57  ;;  %v1016_v61 = vadd.f32 %v2052_v59, %v1008_v39 }
 0x7ae   :  { %v1009_v60 = vmul.f32 %v2051_v51, %v1001_v58  ;;  %v1018_v3 = vmax.f32 %v1016_v61, 0.0 }
 0x7b0   :  { %v1017_v2 = vadd.f32 %v2052_v59, %v1009_v60 }
 0x7b2   :  { %v1019_v5 = vmax.f32 %v1017_v2, 0.0 }
 0x7b4   :  { %v1089_v10 = vpack.c.bf16 %v1019_v5, %v1018_v3  ;;  %v2430_v30 = vpop.eup %2429  ;;  %v2073_v5 = vld [vmem:[%s3093_s17 + $0x1] ss:$0 sm:$0xff] }
 0x7b5   :  { %v1068_v12 = vmul.f32 %v2430_v30, %v2837_v40  ;;  %v2432_v9 = vpop.eup %2431 }
 0x7b6   :  { %2261 = vmatmul.mubr.msk.bf16.vlgmr.msra.gmra.mrb[16].mxu1 %vm157_vm5, %v1089_v10  ;;  %v1070_v27 = vmul.f32 %v2432_v9, %v2842_v53  ;;  %v2402_v9 = vld [vmem:[%s3094_s18 + $0x18] sm:$0xff]  }
 0x7b7   :  { %2276 = vmatprep.mubr.msk.f32.mxu1 %vm704_vm7, %v2741_v6  ;;  %v1072_v14 = vmul.f32 %v2051_v51, %v1068_v12 }
 0x7b8   :  { %v1074_v36 = vmul.f32 %v2051_v51, %v1070_v27 }
 0x7b9   :  { %v1076_v41 = vadd.f32 %v2052_v59, %v1072_v14 }
 0x7ba   :  { %v1078_v50 = vadd.f32 %v2052_v59, %v1074_v36 }
 0x7bb   :  { %v1080_v46 = vmax.f32 %v1076_v41, 0.0 }
 0x7bc   :  { %v1082_v40 = vmax.f32 %v1078_v50, 0.0 }
 0x835   :  { %v1049_v24 = vpop.xlane.xlu1 %1048 }
 0x836   :  { %v1057_v25 = vmul.f32 0.03125, %v1049_v24 }
 0x838   :  { %v1061_v48 = vadd.f32 1e-05, %v1057_v25 }
 0x839   :  { %v1055_v26 = vpop.xlane.xlu1 %1054 }
 0x83a   :  { %2433 = vrsqrt.f32 %v1061_v48  ;;  %v1059_v28 = vmul.f32 0.03125, %v1055_v26 }
 0x83c   :  { %v1063_v33 = vadd.f32 1e-05, %v1059_v28 }
 0x83e   :  { %2435 = vrsqrt.f32 %v1063_v33 }
 0x844   :  { %v2434_v32 = vpop.eup %2433 }
 0x845   :  { %v1069_v34 = vmul.f32 %v2434_v32, %v1037_v44 }
 0x847   :  { %v1073_v37 = vmul.f32 %v2051_v51, %v1069_v34 }
 0x848   :  { %v2436_v42 = vpop.eup %2435 }
 0x849   :  { %v1071_v52 = vmul.f32 %v2436_v42, %v1039_v18  ;;  %v1077_v54 = vadd.f32 %v2052_v59, %v1073_v37 }
 0x84b   :  { %v1075_v15 = vmul.f32 %v2051_v51, %v1071_v52  ;;  %v1081_v47 = vmax.f32 %v1077_v54, 0.0 }
 0x84d   :  { %v1151_v55 = vpack.c.bf16 %v1081_v47, %v1080_v46  ;;  %v1079_v39 = vadd.f32 %v2052_v59, %v1075_v15 }
 0x84f   :  { %2268 = vmatprep.mubr.msk.bf16.mxu0 %vm157_vm5, %v1151_v55  ;;  %v1083_v56 = vmax.f32 %v1079_v39, 0.0 }
 0x851   :  { %v1152_v53 = vpack.c.bf16 %v1083_v56, %v1082_v40 }
 0x853   :  { %2269 = vmatmul.mubr.msk.bf16.vlgmr.msra.gmra.mrb[20].mxu0 %vm157_vm5, %v1152_v53 }
 0x854   :  { %2290 = vmatprep.mubr.msk.f32.mxu0 %vm157_vm5, %v2794_v7  ;;  %v2401_v7 = vld [vmem:[%s3094_s18 + $0x10] sm:$0xff]  }
 0x889   :  { %v1139_v44 = vpop.f32.mrb[16].mxu1 }
 0x88a   :  { %v2262_v57 = vpop.f32.mrb[17].mxu1 }
 0x88b   :  { %v1142_v18 = vpop.f32.mrb[18].mxu1 }
 0x88c   :  { %v2357_v58 = vpack.c.bf16 %v1142_v18, %v1139_v44  ;;  %v2263_v51 = vpop.f32.mrb[19].mxu1 }
 0x88e   :  { %2358 = vmatprep.subr.bf16.mxu1 %v2357_v58 }
 0x88f   :  { %2360 = vmatpush3.bf16.msra.mxu1 %v2357_v58 }
 0x890   :  { %2293 = vmatprep.subr.bf16.mxu1 %v2451_v0 }
 0x892   :  { %2277 = vmatmul.mubr.msk.f32.vlgmr.msra.gmra.mrb[14].mxu1 %vm704_vm7, %v2776_v62 }
 0x893   :  { %2279 = vmatprep.mubr.msk.f32.mxu1 %vm704_vm7, %v2779_v63  ;;  %2294 = vmatpush3.bf16.msra.mxu1 %v2401_v7 }
 0x894   :  { %2295 = vmatprep.subr.bf16.mxu1 %v2451_v0 }
 0x896   :  { %2280 = vmatmul.mubr.msk.f32.gmra.mrb[20].mxu1 %vm704_vm7, %v2787_v1 }
 0x897   :  { %2297 = vmatprep.mubr.msk.bf16.mxu1 %vm2452_vm1, %v2451_v0  ;;  %2296 = vmatpush3.bf16.msra.mxu1 %v2402_v9 }
 0x898   :  { %2309 = vmatprep.subr.bf16.mxu1 %v2451_v0 }
 0x926   :  { %v2270_v59 = vpop.f32.mrb[20].mxu0 }
 0x927   :  { %v1205_v60 = vpop.f32.mrb[21].mxu0 }
 0x928   :  { %v2271_v61 = vpop.f32.mrb[22].mxu0 }
 0x929   :  { %v1208_v2 = vpop.f32.mrb[23].mxu0 }
 0x965   :  { %v2278_v3 = vpop.f32.mrb[14].mxu1 }
 0x966   :  { %v1292_v10 = vadd.f32 %v2278_v3, %v1208_v2  ;;  %v1286_v13 = vpop.f32.mrb[15].mxu1  ;;  %v2406_v2 = vld [vmem:[%s3097_s21 + $0x8] sm:$0xff]  }
 0x967   :  { %v1287_v17 = vadd.f32 %v1286_v13, %v1205_v60 }
 0x968   :  { %v1314_v19 = vadd.f32 %v2073_v5, %v1292_v10 }
 0x969   :  { %v1313_v20 = vadd.f32 %v2073_v5, %v1287_v17  ;;  %v2281_v21 = vpop.f32.mrb[20].mxu1 }
 0x96a   :  { %v1318_v22 = vmax.f32 %v1314_v19, 0.0  ;;  %v1302_v23 = vadd.f32 %v2281_v21, %v2271_v61  ;;  %v1296_v43 = vpop.f32.mrb[21].mxu1 }
 0x96b   :  { %v1317_v24 = vmax.f32 %v1313_v20, 0.0  ;;  %v1297_v25 = vadd.f32 %v2270_v59, %v1296_v43 }
 0x96c   :  { %v1316_v48 = vadd.f32 %v2073_v5, %v1302_v23  ;;  %v1469_v58 = vadd.f32 %v1318_v22, %v2869_v29  ;;  %v2403_v29 = vld [vmem:[%s3096_s20] sm:$0xff]  }
 0x96d   :  { %v1315_v26 = vadd.f32 %v2073_v5, %v1297_v25  ;;  %v2361_v28 = vpack.c.bf16 %v1318_v22, %v1317_v24  ;;  %v1468_v57 = vadd.f32 %v1317_v24, %v2809_v35 }
 0x96e   :  { %v1320_v30 = vmax.f32 %v1316_v48, 0.0  ;;  %v1507_v59 = vsel %vm157_vm5, %v1469_v58, 0.0 }
 0x96f   :  { %v1319_v33 = vmax.f32 %v1315_v26, 0.0  ;;  %2362 = vmatprep.subr.bf16.mxu0 %v2361_v28  ;;  %v1504_v51 = vsel %vm157_vm5, %v1468_v57, 0.0 }
 0x970   :  { %2364 = vmatpush3.bf16.msra.mxu0 %v2361_v28  ;;  %v1471_v60 = vadd.f32 %v1320_v30, %v2876_v31  ;;  %v2405_v31 = vld [vmem:[%s3096_s20 + $0x8] sm:$0xff]  }
 0x971   :  { %v2365_v12 = vpack.c.bf16 %v1320_v30, %v1319_v33  ;;  %v1470_v7 = vadd.f32 %v1319_v33, %v2817_v45  ;;  %v2404_v45 = vld [vmem:[%s3097_s21] sm:$0xff]  }
 0x972   :  { %v1513_v35 = vsel %vm157_vm5, %v1471_v60, 0.0 }
 0x973   :  { %2366 = vmatprep.subr.bf16.mxu0 %v2365_v12  ;;  %v1510_v61 = vsel %vm157_vm5, %v1470_v7, 0.0 }
 0x974   :  { %2368 = vmatpush3.bf16.msra.mxu0 %v2365_v12 }
 0x975   :  { %2301 = vmatprep.subr.bf16.mxu0 %v2451_v0 }
 0x977   :  { %2291 = vmatmul.mubr.msk.f32.vlgmr.msra.gmra.mrb[24].mxu0 %vm157_vm5, %v2822_v11  ;;  %v2081_v11 = vld [vmem:[%s3095_s19 + $0x1] ss:$0 sm:$0xff] }
 0x978   :  { %2305 = vmatprep.mubr.msk.bf16.mxu0 %vm2452_vm1, %v2451_v0  ;;  %2302 = vmatpush3.bf16.msra.mxu0 %v2403_v29 }
 0x979   :  { %2303 = vmatprep.subr.bf16.mxu0 %v2451_v0 }
 0x97c   :  { %2304 = vmatpush3.bf16.msra.mxu0 %v2405_v31 }
 0xa4a   :  { %v2292_v27 = vpop.f32.mrb[24].mxu0 }
 0xa4b   :  { %v1387_v14 = vpop.f32.mrb[25].mxu0 }
 0xa4c   :  { %v1401_v32 = vpack.c.bf16 %v2292_v27, %v1387_v14 }
 0xa4e   :  { %2298 = vmatmul.mubr.msk.bf16.vlgmr.msra.gmra.mrb[24].mxu1 %vm157_vm5, %v1401_v32 }
 0xa4f   :  { %2313 = vmatprep.mubr.msk.bf16.mxu1 %vm2452_vm1, %v2451_v0  ;;  %2310 = vmatpush3.bf16.msra.mxu1 %v2404_v45  ;;  %vm1961_vm1 = vcmp.lt.s32.totalorder %v2737_v4, 1 }
 0xa50   :  { %2311 = vmatprep.subr.bf16.mxu1 %v2451_v0 }
 0xa53   :  { %2312 = vmatpush3.bf16.msra.mxu1 %v2406_v2 }
 0xb21   :  { %v1459_v34 = vpop.f32.mrb[24].mxu1 }
 0xb22   :  { %v1460_v36 = vadd.f32 %v2081_v11, %v1459_v34  ;;  %v2299_v37 = vpop.f32.mrb[25].mxu1 }
 0xb23   :  { %v1462_v41 = vpop.f32.mrb[26].mxu1 }
 0xb24   :  { %v1463_v42 = vadd.f32 %v2081_v11, %v1462_v41  ;;  %v2300_v52 = vpop.f32.mrb[27].mxu1  ;;  %v1466_v54 = vadd.f32 %v1460_v36, %v2853_v8 }
 0xb26   :  { %v1472_v15 = vsel %vm157_vm5, %v1466_v54, 0.0  ;;  %v1467_v46 = vadd.f32 %v1463_v42, %v2856_v16 }
 0xb27   :  { %1473 = vadd.xlane.f32.xlu0 %v1472_v15 }
 0xb28   :  { %v1475_v47 = vsel %vm157_vm5, %v1467_v46, 0.0 }
 0xb29   :  { %1476 = vadd.xlane.f32.xlu1 %v1475_v47 }
 0xbb4   :  { %v1474_v50 = vpop.xlane.xlu0 %1473 }
 0xbb5   :  { %v1478_v55 = vmul.f32 0.03125, %v1474_v50 }
 0xbb6   :  { %v1477_v39 = vpop.xlane.xlu1 %1476 }
 0xbb7   :  { %v2947_v40 = vsub.f32 %v1466_v54, %v1478_v55  ;;  %v1479_v56 = vmul.f32 0.03125, %v1477_v39 }
 0xbb9   :  { %v2949_v53 = vsub.f32 %v1467_v46, %v1479_v56  ;;  %v1482_v44 = vmul.f32 %v2947_v40, %v2947_v40  ;;  %v117_v56 = vld [vmem:[%s3098_s1 + $0x10] sm:$0xff] }
 0xbbb   :  { %v1484_v8 = vsel %vm157_vm5, %v1482_v44, 0.0  ;;  %v1483_v16 = vmul.f32 %v2949_v53, %v2949_v53  ;;  %v2407_v44 = vld [vmem:[%s3099_s22] sm:$0xff]  }
 0xbbc   :  { %1485 = vadd.xlane.f32.xlu0 %v1484_v8  ;;  %2337 = vmatprep.subr.bf16.mxu1 %v2407_v44  ;;  %v2408_v8 = vld [vmem:[%s3099_s22 + $0x8] sm:$0xff]  }
 0xbbd   :  { %v1487_v18 = vsel %vm157_vm5, %v1483_v16, 0.0 }
 0xbbe   :  { %1488 = vadd.xlane.f32.xlu1 %v1487_v18 }
 0xbc0   :  { %1505 = vadd.xlane.f32.xlu0 %v1504_v51 }
 0xbc2   :  { %1508 = vadd.xlane.f32.xlu1 %v1507_v59 }
 0xbc4   :  { %1511 = vadd.xlane.f32.xlu0 %v1510_v61 }
 0xbc6   :  { %1514 = vadd.xlane.f32.xlu1 %v1513_v35 }
 0xc49   :  { %v1486_v3 = vpop.xlane.xlu0 %1485 }
 0xc4a   :  { %v1490_v5 = vmul.f32 0.03125, %v1486_v3 }
 0xc4b   :  { %v1489_v10 = vpop.xlane.xlu1 %1488 }
 0xc4c   :  { %v1492_v13 = vadd.f32 1e-05, %v1490_v5  ;;  %v1491_v17 = vmul.f32 0.03125, %v1489_v10 }
 0xc4d   :  { %v1506_v19 = vpop.xlane.xlu0 %1505 }
 0xc4e   :  { %2437 = vrsqrt.f32 %v1492_v13  ;;  %v1493_v20 = vadd.f32 1e-05, %v1491_v17  ;;  %v1516_v21 = vmul.f32 0.03125, %v1506_v19  ;;  %v2449_v17 = vld [vmem:[%s3089_s13] ss:$0 sm:$0xff] }
 0xc4f   :  { %v1509_v22 = vpop.xlane.xlu1 %1508 }
 0xc50   :  { %2439 = vrsqrt.f32 %v1493_v20  ;;  %v2979_v23 = vsub.f32 %v1468_v57, %v1516_v21  ;;  %v1517_v43 = vmul.f32 0.03125, %v1509_v22 }
 0xc51   :  { %v1512_v24 = vpop.xlane.xlu0 %1511 }
 0xc52   :  { %v2981_v25 = vsub.f32 %v1469_v58, %v1517_v43  ;;  %v1518_v48 = vmul.f32 0.03125, %v1512_v24  ;;  %v1524_v26 = vmul.f32 %v2979_v23, %v2979_v23 }
 0xc53   :  { %v1515_v28 = vpop.xlane.xlu1 %1514 }
 0xc54   :  { %v2985_v30 = vsub.f32 %v1470_v7, %v1518_v48  ;;  %v1519_v33 = vmul.f32 0.03125, %v1515_v28  ;;  %v1528_v12 = vsel %vm157_vm5, %v1524_v26, 0.0  ;;  %v1525_v9 = vmul.f32 %v2981_v25, %v2981_v25 }
 0xc55   :  { %1529 = vadd.xlane.f32.xlu0 %v1528_v12 }
 0xc56   :  { %v2990_v27 = vsub.f32 %v1471_v60, %v1519_v33  ;;  %v1531_v14 = vsel %vm157_vm5, %v1525_v9, 0.0  ;;  %v1526_v32 = vmul.f32 %v2985_v30, %v2985_v30 }
 0xc57   :  { %1532 = vadd.xlane.f32.xlu1 %v1531_v14 }
 0xc58   :  { %v2438_v11 = vpop.eup %2437  ;;  %v1534_v34 = vsel %vm157_vm5, %v1526_v32, 0.0  ;;  %v1527_v36 = vmul.f32 %v2990_v27, %v2990_v27 }
 0xc59   :  { %v1496_v37 = vmul.f32 %v2438_v11, %v2947_v40  ;;  %1535 = vadd.xlane.f32.xlu0 %v1534_v34  ;;  %v116_v40 = vld [vmem:[%s3098_s1 + $0x8] sm:$0xff] }
 0xc5a   :  { %v2440_v41 = vpop.eup %2439  ;;  %v1537_v42 = vsel %vm157_vm5, %v1527_v36, 0.0 }
 0xc5b   :  { %v1498_v52 = vmul.f32 %v2701_v38, %v1496_v37  ;;  %v1497_v54 = vmul.f32 %v2440_v41, %v2949_v53  ;;  %1538 = vadd.xlane.f32.xlu1 %v1537_v42  ;;  %v118_v53 = vld [vmem:[%s3098_s1 + $0x18] sm:$0xff] }
 0xc5d   :  { %v1499_v15 = vmul.f32 %v2701_v38, %v1497_v54  ;;  %v1500_v46 = vadd.f32 %v2718_v49, %v1498_v52  ;;  %v115_v38 = vld [vmem:[%s3098_s1] sm:$0xff] }
 0xc5f   :  { %v1501_v47 = vadd.f32 %v2718_v49, %v1499_v15  ;;  %v1502_v50 = vmax.f32 %v1500_v46, 0.0 }
 0xc61   :  { %v1503_v55 = vmax.f32 %v1501_v47, 0.0 }
 0xc63   :  { %v1572_v39 = vpack.c.bf16 %v1503_v55, %v1502_v50 }
 0xc65   :  { %2306 = vmatmul.mubr.msk.bf16.vlgmr.msra.gmra.mrb[28].mxu0 %vm157_vm5, %v1572_v39  ;;  %2314 = vmatmul.mubr.msk.bf16.vlgmr.msra.gmra.mrb[28].mxu1 %vm157_vm5, %v1572_v39 }
 0xc66   :  { %2338 = vmatpush3.bf16.msra.mxu1 %v2407_v44 }
 0xc67   :  { %2339 = vmatprep.subr.bf16.mxu1 %v2408_v8 }
 0xc6a   :  { %2340 = vmatpush3.bf16.msra.mxu1 %v2408_v8 }
 0xc6c   :  { %123 = vperm.xlu1 %2386, %v116_v40  }
 0xc6f   :  { %120 = vperm.xlu0 %2385, %v115_v38  }
 0xc70   :  { %126 = vperm.xlu1 %2386, %v117_v56   ;;  %v30_v56 = vstv %s3100_s23 }
 0xc71   :  { %31 = vst [vmem:[#allocation2] sm:$0x1] %v30_v56 }
 0xc73   :  { %129 = vperm.xlu0 %2385, %v118_v53  }
 0xce2   :  { %v1530_v16 = vpop.xlane.xlu0 %1529 }
 0xce3   :  { %v1540_v57 = vmul.f32 0.03125, %v1530_v16  ;;  %v2103_v16 = vld [vmem:[#allocation2] ss:$0 sm:$0xff] }
 0xce4   :  { %v1533_v18 = vpop.xlane.xlu1 %1532 }
 0xce5   :  { %v1544_v58 = vadd.f32 1e-05, %v1540_v57  ;;  %v1541_v51 = vmul.f32 0.03125, %v1533_v18 }
 0xce6   :  { %v1536_v7 = vpop.xlane.xlu0 %1535 }
 0xce7   :  { %2441 = vrsqrt.f32 %v1544_v58  ;;  %v1545_v59 = vadd.f32 1e-05, %v1541_v51  ;;  %v1542_v60 = vmul.f32 0.03125, %v1536_v7 }
 0xce8   :  { %v1539_v61 = vpop.xlane.xlu1 %1538 }
 0xce9   :  { %2443 = vrsqrt.f32 %v1545_v59  ;;  %v1546_v35 = vadd.f32 1e-05, %v1542_v60  ;;  %v1543_v29 = vmul.f32 0.03125, %v1539_v61 }
 0xceb   :  { %2445 = vrsqrt.f32 %v1546_v35  ;;  %v1547_v45 = vadd.f32 1e-05, %v1543_v29 }
 0xcec   :  { %v124_v34 = vpop.permute.xlu1 %123 }
 0xced   :  { %2447 = vrsqrt.f32 %v1547_v45  ;;  %vm132_vm14 = vcmp.eq.s32.totalorder %v124_v34, %v2737_v4 }
 0xcee   :  { %v121_v31 = vpop.permute.xlu0 %120  ;;  %v2009_v39 = vsel %vm132_vm14, 1.0, %v2451_v0 }
 0xcef   :  { %vm131_vm13 = vcmp.eq.s32.totalorder %v121_v31, %v2737_v4 }
 0xcf0   :  { %v2008_v2 = vsel %vm131_vm13, 1.0, %v2451_v0 }
 0xcf1   :  { %v2442_v3 = vpop.eup %2441  ;;  %2321 = vmatprep.mubr.msk.f32.mxu0 %vm704_vm7, %v2008_v2 }
 0xcf2   :  { %v1552_v5 = vmul.f32 %v2442_v3, %v2979_v23  ;;  %v2450_v23 = vld [vmem:[%s3090_s14] ss:$0 sm:$0xff]  ;;  %v130_v55 = vpop.permute.xlu0 %129 }
 0xcf3   :  { %v2444_v10 = vpop.eup %2443  ;;  %vm134_vm0 = vcmp.eq.s32.totalorder %v130_v55, %v2737_v4 }
 0xcf4   :  { %v1553_v13 = vmul.f32 %v2444_v10, %v2981_v25  ;;  %v1556_v19 = vmul.f32 %v2449_v17, %v1552_v5  ;;  %v2011_v38 = vsel %vm134_vm0, 1.0, %v2451_v0 }
 0xcf5   :  { %v2446_v20 = vpop.eup %2445 }
 0xcf6   :  { %v1554_v21 = vmul.f32 %v2446_v20, %v2985_v30  ;;  %v1557_v22 = vmul.f32 %v2449_v17, %v1553_v13  ;;  %v1560_v43 = vadd.f32 %v2718_v49, %v1556_v19 }
 0xcf7   :  { %v2448_v24 = vpop.eup %2447 }
 0xcf8   :  { %v1558_v48 = vmul.f32 %v2449_v17, %v1554_v21  ;;  %v1555_v26 = vmul.f32 %v2448_v24, %v2990_v27  ;;  %v1561_v25 = vadd.f32 %v2450_v23, %v1557_v22  ;;  %v1564_v33 = vmax.f32 %v1560_v43, 0.0  ;;  %v127_v27 = vpop.permute.xlu1 %126 }
 0xcf9   :  { %vm133_vm15 = vcmp.eq.s32.totalorder %v127_v27, %v2737_v4 }
 0xcfa   :  { %v1559_v28 = vmul.f32 %v2449_v17, %v1555_v26  ;;  %v1565_v12 = vmax.f32 %v1561_v25, 0.0  ;;  %v1562_v9 = vadd.f32 %v2450_v23, %v1558_v48  ;;  %v2010_v40 = vsel %vm133_vm15, 1.0, %v2451_v0 }
 0xcfb   :  { %v32_v0 = vstv %s3101_s24 }
 0xcfc   :  { %v1872_v14 = vpack.c.bf16 %v1565_v12, %v1564_v33  ;;  %v1563_v32 = vadd.f32 %v2450_v23, %v1559_v28  ;;  %v1566_v30 = vmax.f32 %v1562_v9, 0.0  ;;  %33 = vst [vmem:[#allocation3] sm:$0x1] %v32_v0 }
 0xcfe   :  { %2341 = vmatprep.mubr.msk.bf16.mxu1 %vm157_vm5, %v1872_v14  ;;  %v1567_v11 = vmax.f32 %v1563_v32, 0.0 }
 0xd00   :  { %v1873_v49 = vpack.c.bf16 %v1567_v11, %v1566_v30 }
 0xd02   :  { %2342 = vmatmul.mubr.msk.bf16.vlgmr.msra.gmra.mrb[32].mxu1 %vm157_vm5, %v1873_v49 }
 0xd03   :  { %v2104_v3 = vld [vmem:[#allocation3] ss:$0 sm:$0xff] }
 0xd38   :  { %v1622_v36 = vpop.f32.mrb[28].mxu0  ;;  %v1679_v37 = vpop.f32.mrb[28].mxu1 }
 0xd39   :  { %v2307_v41 = vpop.f32.mrb[29].mxu0  ;;  %v2315_v42 = vpop.f32.mrb[29].mxu1 }
 0xd3a   :  { %v1625_v52 = vpop.f32.mrb[30].mxu0  ;;  %v1682_v54 = vpop.f32.mrb[30].mxu1 }
 0xd3b   :  { %v2373_v15 = vpack.c.bf16 %v1625_v52, %v1622_v36  ;;  %v2369_v46 = vpack.c.bf16 %v1682_v54, %v1679_v37  ;;  %v2308_v47 = vpop.f32.mrb[31].mxu0  ;;  %v2316_v50 = vpop.f32.mrb[31].mxu1 }
 0xd3d   :  { %2370 = vmatprep.subr.bf16.mxu0 %v2369_v46 }
 0xd3e   :  { %2372 = vmatpush3.bf16.msra.mxu0 %v2369_v46 }
 0xd3f   :  { %2374 = vmatprep.subr.bf16.mxu0 %v2373_v15 }
 0xd41   :  { %2322 = vmatmul.mubr.msk.f32.vlgmr.msra.gmra.mrb[26].mxu0 %vm704_vm7, %v2009_v39 }
 0xd42   :  { %2324 = vmatprep.mubr.msk.f32.mxu0 %vm704_vm7, %v2010_v40  ;;  %2376 = vmatpush3.bf16.msra.mxu0 %v2373_v15 }
 0xd45   :  { %2325 = vmatmul.mubr.msk.f32.gmra.mrb[32].mxu0 %vm704_vm7, %v2011_v38 }
 0xd46   :  { %2331 = vmatprep.mubr.msk.f32.mxu0 %vm704_vm7, %v2741_v6 }
 0xd49   :  { %2332 = vmatmul.mubr.msk.f32.vlgmr.msra.gmra.mrb[26].mxu0 %vm704_vm7, %v2776_v62 }
 0xd4a   :  { %2334 = vmatprep.mubr.msk.f32.mxu0 %vm704_vm7, %v2779_v63 }
 0xd4d   :  { %2335 = vmatmul.mubr.msk.f32.gmra.mrb[32].mxu0 %vm704_vm7, %v2787_v1 }
 0xdd5   :  { %v2343_v6 = vpop.f32.mrb[32].mxu1 }
 0xdd6   :  { %v1926_v53 = vpop.f32.mrb[33].mxu1 }
 0xdd7   :  { %v2344_v44 = vpop.f32.mrb[34].mxu1 }
 0xdd8   :  { %v1929_v62 = vpop.f32.mrb[35].mxu1 }
 0xe1c   :  { %v2333_v8 = vpop.f32.mrb[26].mxu0 }
 0xe1d   :  { %v1942_v63 = vadd.f32 %v2333_v8, %v1929_v62  ;;  %v1849_v57 = vpop.f32.mrb[27].mxu0 }
 0xe1e   :  { %v1941_v18 = vadd.f32 %v1926_v53, %v1849_v57 }
 0xe1f   :  { %v1953_v1 = vadd.f32 %v2103_v16, %v1942_v63 }
 0xe20   :  { %v1952_v58 = vadd.f32 %v2103_v16, %v1941_v18  ;;  %v2336_v51 = vpop.f32.mrb[32].mxu0 }
 0xe21   :  { %v1957_v7 = vmax.f32 %v1953_v1, 0.0  ;;  %v1944_v59 = vadd.f32 %v2344_v44, %v2336_v51  ;;  %v1859_v60 = vpop.f32.mrb[33].mxu0 }
 0xe22   :  { %v1956_v61 = vmax.f32 %v1952_v58, 0.0  ;;  %v1943_v35 = vadd.f32 %v2343_v6, %v1859_v60 }
 0xe23   :  { %v1955_v29 = vadd.f32 %v2103_v16, %v1944_v59  ;;  %1969 = vperm.xlu0 %2385, %v1957_v7  }
 0xe24   :  { %v1954_v45 = vadd.f32 %v2103_v16, %v1943_v35  ;;  %1964 = vperm.xlu1 %2386, %v1956_v61  }
 0xe25   :  { %v1959_v31 = vmax.f32 %v1955_v29, 0.0 }
 0xe26   :  { %v1958_v2 = vmax.f32 %v1954_v45, 0.0 }
 0xe27   :  { %1979 = vperm.xlu0 %2385, %v1959_v31  }
 0xe28   :  { %1974 = vperm.xlu1 %2386, %v1958_v2  }
 0xe2c   :  { %1988 = vperm.xlu1 %2386, %v2104_v3  }
 0xea2   :  { %v1970_v10 = vpop.permute.xlu0 %1969 }
 0xea3   :  { %v1965_v5 = vpop.permute.xlu1 %1964 }
 0xea6   :  { %v1980_v17 = vpop.permute.xlu0 %1979 }
 0xea7   :  { %v1975_v13 = vpop.permute.xlu1 %1974 }
 0xeab   :  { %v1989_v19 = vpop.permute.xlu1 %1988 }
 0xeac   :  { %v1991_v20 = vsel %vm1961_vm1, %v1965_v5, %v1989_v19  ;;  %v1992_v21 = vsel %vm1961_vm1, %v1970_v10, %v1989_v19  ;;  %v1993_v22 = vsel %vm1961_vm1, %v1975_v13, %v1989_v19  ;;  %v1994_v43 = vsel %vm1961_vm1, %v1980_v17, %v1989_v19 }
 0xead   :  { %1996 = vst.msk [vmem:[%s3102_s25] sm:$0xff] %vm1995_vm2, %v1991_v20  ;;  %1997 = vst.msk [vmem:[%s3102_s25 + $0x8] sm:$0xff] %vm1995_vm2, %v1992_v21 }
 0xeae   :  { %1998 = vst.msk [vmem:[%s3102_s25 + $0x10] sm:$0xff] %vm1995_vm2, %v1993_v22  ;;  %1999 = vst.msk [vmem:[%s3102_s25 + $0x18] sm:$0xff] %vm1995_vm2, %v1994_v43 }

</bundles_post_ra>
